<compile_context>
chip_gen: v5e
topology: v5e:2x2
jax: 0.10.0
libtpu: 0.0.40
codegen_flags: <defaults>
</compile_context>

<pallas_src>
import jax
import jax.numpy as jnp
from jax.experimental import pallas as pl
from jax.experimental.pallas import tpu as pltpu

INPUT_SIZE = 784
HIDDEN_SIZE = 500
NUM_CLASSES = 10

HID_P = 512    # hidden padded to 4 * 128 (lane-dense h)
CLS_P = 128    # classes padded to 128 (lane-dense, unmasked output stores)


def _round_up(n, m):
    return ((n + m - 1) // m) * m


def _pick_tm(batch):
    """Batch tile: large enough to fill the MXU (up to 512 rows), a multiple
    of 16 (bf16 sublane packing), but small enough to keep >= 2 grid steps
    when possible so both v7x TensorCores get work."""
    if batch >= 1024:
        return 512
    return max(16, min(512, _round_up(pl.cdiv(batch, 2), 16)))


def mlp_kernel(x_ref, w1_ref, b1_ref, w2_ref, b2_ref, out_ref):
    # x arrives as f32 straight from HBM; cast to bf16 on the VPU (this hides
    # under the MXU work and avoids a wrapper-side pad/cast pass over x).
    x = x_ref[...].astype(jnp.bfloat16)
    # fc1: bf16 operands on the MXU, f32 accumulation; bias + ReLU in f32.
    h = jnp.dot(x, w1_ref[...], preferred_element_type=jnp.float32)
    h = jnp.maximum(h + b1_ref[...], 0.0)
    # fc2: cast activations back to bf16 for the MXU, accumulate in f32.
    o = jnp.dot(h.astype(jnp.bfloat16), w2_ref[...],
                preferred_element_type=jnp.float32)
    out_ref[...] = (o + b2_ref[...]).astype(out_ref.dtype)


def _pad2d(a, rows, cols):
    return jnp.pad(a, ((0, rows - a.shape[0]), (0, cols - a.shape[1])))


@jax.jit
def neural_net2_forward(x, w1, b1, w2, b2):
    """x: [B, 784] f32. w1: [784, 500], b1: [1, 500], w2: [500, 10], b2: [1, 10].
    Returns logits [B, 10] f32 == relu(x @ w1 + b1) @ w2 + b2."""
    B = x.shape[0]
    TM = _pick_tm(B)
    nb = pl.cdiv(B, TM)

    # Weights / biases: pad hidden & class axes to lane multiples, cast the
    # matmul operands to bf16.  Tiny and constant -> negligible per-call cost.
    w1p = _pad2d(w1, INPUT_SIZE, HID_P).astype(jnp.bfloat16)
    w2p = _pad2d(w2, HID_P, CLS_P).astype(jnp.bfloat16)
    b1p = _pad2d(b1, 1, HID_P)          # f32, added to the f32 accumulator
    b2p = _pad2d(b2, 1, CLS_P)

    out = pl.pallas_call(
        mlp_kernel,
        out_shape=jax.ShapeDtypeStruct((B, CLS_P), jnp.float32),
        grid=(nb,),
        in_specs=[
            # x batch tile, unpadded f32; 784 is a full-dim lane block and the
            # ragged last batch tile is handled by Pallas (masked out stores).
            pl.BlockSpec((TM, INPUT_SIZE), lambda i: (i, 0)),
            pl.BlockSpec((INPUT_SIZE, HID_P), lambda i: (0, 0)),  # w1 resident
            pl.BlockSpec((1, HID_P), lambda i: (0, 0)),           # b1 resident
            pl.BlockSpec((HID_P, CLS_P), lambda i: (0, 0)),       # w2 resident
            pl.BlockSpec((1, CLS_P), lambda i: (0, 0)),           # b2 resident
        ],
        out_specs=pl.BlockSpec((TM, CLS_P), lambda i: (i, 0)),
        compiler_params=pltpu.CompilerParams(
            dimension_semantics=("parallel",)),
    )(x, w1p, b1p, w2p, b2p)

    return out[:, :NUM_CLASSES]


def init_params(key):
    # Deterministic init mimicking nn.Linear's U(-1/sqrt(fan_in), 1/sqrt(fan_in)).
    k1, k2, k3, k4 = jax.random.split(key, 4)
    bound1 = 1.0 / (INPUT_SIZE ** 0.5)
    bound2 = 1.0 / (HIDDEN_SIZE ** 0.5)
    w1 = jax.random.uniform(k1, (INPUT_SIZE, HIDDEN_SIZE), jnp.float32,
                            -bound1, bound1)
    b1 = jax.random.uniform(k2, (1, HIDDEN_SIZE), jnp.float32, -bound1, bound1)
    w2 = jax.random.uniform(k3, (HIDDEN_SIZE, NUM_CLASSES), jnp.float32,
                            -bound2, bound2)
    b2 = jax.random.uniform(k4, (1, NUM_CLASSES), jnp.float32, -bound2, bound2)
    return w1, b1, w2, b2


if __name__ == "__main__":
    key = jax.random.PRNGKey(0)
    kx, kp = jax.random.split(key)
    # 40 rows -> TM=32, 2 grid steps, ragged last tile (exercises masking,
    # weight residency across tiles, and megacore sharding).
    BATCH = 40
    x = jax.random.normal(kx, (BATCH, INPUT_SIZE), jnp.float32)
    w1, b1, w2, b2 = init_params(kp)

    out = jax.block_until_ready(neural_net2_forward(x, w1, b1, w2, b2))
    assert out.shape == (BATCH, NUM_CLASSES)

    # Strict check against a reference that emulates the kernel's
    # bf16-operand / f32-accumulate path (differences = summation order only).
    rd = lambda a: a.astype(jnp.bfloat16).astype(jnp.float32)
    h_ref = jnp.maximum(rd(x) @ rd(w1) + b1, 0.0)
    ref_bf16 = rd(h_ref) @ rd(w2) + b2
    assert jnp.allclose(out, ref_bf16, atol=2e-3, rtol=2e-3)

    # Loose check against full-f32 PyTorch-equivalent math (bf16 rounding only).
    ref_f32 = jnp.maximum(x @ w1 + b1, 0.0) @ w2 + b2
    assert jnp.allclose(out, ref_f32, atol=5e-2, rtol=5e-2)

    print("KERNEL_OK")
</pallas_src>

<mosaic_0001>
module attributes {stable_mosaic.version = 11 : i64} {
  func.func @mlp_kernel(%arg0: i32, %arg1: memref<32x784xf32, #tpu.memory_space<vmem>>, %arg2: memref<784x512xbf16, #tpu.memory_space<vmem>>, %arg3: memref<1x512xf32, #tpu.memory_space<vmem>>, %arg4: memref<512x128xbf16, #tpu.memory_space<vmem>>, %arg5: memref<1x128xf32, #tpu.memory_space<vmem>>, %arg6: memref<32x128xf32, #tpu.memory_space<vmem>>) attributes {dimension_semantics = [#tpu.dimension_semantics<parallel>], iteration_bounds = array<i64: 2>, scalar_prefetch = 0 : i64, scratch_operands = 0 : i64, tpu.core_type = #tpu.core_type<tc>, window_params = [{transform_indices = @transform_0, window_bounds = array<i64: 32, 784>}, {pipeline_mode = #tpu.pipeline_mode<synchronous>, transform_indices = @transform_1, window_bounds = array<i64: 784, 512>}, {pipeline_mode = #tpu.pipeline_mode<synchronous>, transform_indices = @transform_2, window_bounds = array<i64: 1, 512>}, {pipeline_mode = #tpu.pipeline_mode<synchronous>, transform_indices = @transform_3, window_bounds = array<i64: 512, 128>}, {pipeline_mode = #tpu.pipeline_mode<synchronous>, transform_indices = @transform_4, window_bounds = array<i64: 1, 128>}, {transform_indices = @transform_5, window_bounds = array<i64: 32, 128>}]} {
    %c0 = arith.constant 0 : index
    %c0_0 = arith.constant 0 : index
    %0 = vector.load %arg1[%c0, %c0_0] : memref<32x784xf32, #tpu.memory_space<vmem>>, vector<32x784xf32>
    %1 = arith.truncf %0 : vector<32x784xf32> to vector<32x784xbf16>
    %c0_1 = arith.constant 0 : index
    %c0_2 = arith.constant 0 : index
    %2 = vector.load %arg2[%c0_1, %c0_2] : memref<784x512xbf16, #tpu.memory_space<vmem>>, vector<784x512xbf16>
    %cst = arith.constant dense<0.000000e+00> : vector<32x512xf32>
    %3 = tpu.matmul %1, %2, %cst {dimension_numbers = #tpu.dot_dimension_numbers<[1], [0], [0], [1], [0, 0, 1, 1], [], []>} : vector<32x784xbf16>, vector<784x512xbf16>, vector<32x512xf32> -> vector<32x512xf32>
    %c0_3 = arith.constant 0 : index
    %c0_4 = arith.constant 0 : index
    %4 = vector.load %arg3[%c0_3, %c0_4] : memref<1x512xf32, #tpu.memory_space<vmem>>, vector<1x512xf32>
    %5 = vector.broadcast %4 : vector<1x512xf32> to vector<32x512xf32>
    %6 = arith.addf %3, %5 : vector<32x512xf32>
    %cst_5 = arith.constant 0.000000e+00 : f32
    %7 = vector.broadcast %cst_5 : f32 to vector<32x512xf32>
    %8 = arith.maximumf %6, %7 : vector<32x512xf32>
    %9 = arith.truncf %8 : vector<32x512xf32> to vector<32x512xbf16>
    %c0_6 = arith.constant 0 : index
    %c0_7 = arith.constant 0 : index
    %10 = vector.load %arg4[%c0_6, %c0_7] : memref<512x128xbf16, #tpu.memory_space<vmem>>, vector<512x128xbf16>
    %cst_8 = arith.constant dense<0.000000e+00> : vector<32x128xf32>
    %11 = tpu.matmul %9, %10, %cst_8 {dimension_numbers = #tpu.dot_dimension_numbers<[1], [0], [0], [1], [0, 0, 1, 1], [], []>} : vector<32x512xbf16>, vector<512x128xbf16>, vector<32x128xf32> -> vector<32x128xf32>
    %c0_9 = arith.constant 0 : index
    %c0_10 = arith.constant 0 : index
    %12 = vector.load %arg5[%c0_9, %c0_10] : memref<1x128xf32, #tpu.memory_space<vmem>>, vector<1x128xf32>
    %13 = vector.broadcast %12 : vector<1x128xf32> to vector<32x128xf32>
    %14 = arith.addf %11, %13 : vector<32x128xf32>
    %c0_11 = arith.constant 0 : index
    %c0_12 = arith.constant 0 : index
    %15 = vector.load %arg6[%c0_11, %c0_12] : memref<32x128xf32, #tpu.memory_space<vmem>>, vector<32x128xf32>
    tpu.vector_store %arg6[%c0_11, %c0_12], %14 {strides = array<i32>} : memref<32x128xf32, #tpu.memory_space<vmem>>, vector<32x128xf32>,
    return
  }
  func.func @transform_0(%arg0: i32) -> (i32, i32) {
    %c0_i32 = arith.constant 0 : i32
    %c0_i32_0 = arith.constant 0 : i32
    return %arg0, %c0_i32 : i32, i32
  }
  func.func @transform_1(%arg0: i32) -> (i32, i32) {
    %c0_i32 = arith.constant 0 : i32
    %c0_i32_0 = arith.constant 0 : i32
    %c0_i32_1 = arith.constant 0 : i32
    return %c0_i32, %c0_i32_0 : i32, i32
  }
  func.func @transform_2(%arg0: i32) -> (i32, i32) {
    %c0_i32 = arith.constant 0 : i32
    %c0_i32_0 = arith.constant 0 : i32
    %c0_i32_1 = arith.constant 0 : i32
    return %c0_i32, %c0_i32_0 : i32, i32
  }
  func.func @transform_3(%arg0: i32) -> (i32, i32) {
    %c0_i32 = arith.constant 0 : i32
    %c0_i32_0 = arith.constant 0 : i32
    %c0_i32_1 = arith.constant 0 : i32
    return %c0_i32, %c0_i32_0 : i32, i32
  }
  func.func @transform_4(%arg0: i32) -> (i32, i32) {
    %c0_i32 = arith.constant 0 : i32
    %c0_i32_0 = arith.constant 0 : i32
    %c0_i32_1 = arith.constant 0 : i32
    return %c0_i32, %c0_i32_0 : i32, i32
  }
  func.func @transform_5(%arg0: i32) -> (i32, i32) {
    %c0_i32 = arith.constant 0 : i32
    %c0_i32_0 = arith.constant 0 : i32
    return %arg0, %c0_i32 : i32, i32
  }
}

</mosaic_0001>

<bundles_post_ra>
// kernel: neural_net2_forward.1
= control target key start
LH: loop header
LB: loop body
LE: loop exit
PB: predicated region body
PF: predicated region fallthrough
CT: control target
= control target key end

     0   :  { %s3997_s18 = smov 0   ;;  %s3999_s19 = smov 0   ;;  %s5548_s0 = inlined_call_operand.vmem [shape: f32[40,784], index: 0, kind: input, shape index: {}]   ;;  %s5549_s1 = inlined_call_operand.vmem [shape: bf16[784,512], index: 1, kind: input, shape index: {}]   ;;  %s5550_s2 = inlined_call_operand.vmem [shape: f32[1,512], index: 2, kind: input, shape index: {}]   ;;  %s5551_s3 = inlined_call_operand.vmem [shape: bf16[512,128], index: 3, kind: input, shape index: {}]   ;;  %s5552_s4 = inlined_call_operand.vmem [shape: f32[1,128], index: 4, kind: input, shape index: {}]   ;;  %s5553_s5 = inlined_call_operand.vmem [shape: f32[40,128], index: 5, kind: output, shape index: {}]  }
   0x1   :  { %s4001_s20 = smov 0  }
   0x2 LB: > { %s4010_s21 = sadd.s32 4294967295, %s3933_s20   ;;  %s4012_s22 = sadd.s32 1, %s3933_s20   ;;  %s3933_s20 = sphi %s4001_s20, %s5560_s20   ;;  %s3929_s19 = sphi %s3999_s19, %s5559_s19   ;;  %s3925_s18 = sphi %s3997_s18, %s5558_s18  }
   0x3   : > { %s129_s23 = ssub.s32 %s3933_s20, %s4012_s22  ;;  %s132_s24 = sadd.s32 1, %s3929_s19 }
   0x4   : > { %p130_p0 = scmp.eq.s32.totalorder %s129_s23, 0  ;;  %p142_p1 = scmp.ne.s32.totalorder %s3929_s19, %s3925_s18 }
   0x5   : > { %p143_p2 = scmp.eq.s32.totalorder %s4010_s21, 1  ;;  %p2617_p3 = scmp.ge.s32.totalorder %s3933_s20, 1 }
   0x6   : > { %s4020_s25 = scalar_select %p130_p0, %s3929_s19, %s132_s24  }
   0x7   : > { %p4022_p4 = por %p143_p2, %p142_p1  ;;  %p199_p5 = scmp.lt.s32.totalorder %s3933_s20, 3 }
   0x9   : > { %p200_p6 = pnand %p2617_p3, %p199_p5 }
   0xa   : > { %s4189_s15 = sshll.u32 (!%p200_p6), %s4010_s21, 2  ;;  %s229_s24 = sand.u32 (!%p200_p6), 1, %s3925_s18  }
   0xb   : > { %203 = sbr.rel (%p200_p6) target bundleno = 592 (0x250), region = 40  ;;  %p238_p7 = scmp.lt.s32.totalorder (!%p200_p6), %s4189_s15, 4 }
   0xc   : > { %s2618_s27 = sshll.u32 (!%p200_p6), %s229_s24, 5 }
  0x10   : > { %v2735_v0 = vld [vmem:[%s5549_s1 + $0xe0] sm:$0xf]  ;;  %v3588_v1 = vld [vmem:[%s5549_s1 + $0xec] sm:$0xf0]  ;;  %s239_s11 = scalar_select %p238_p7, %s4189_s15, 4  ;;  %vm1483_vm0 = vcmask 130048  }
  0x11   : > { %v2863_v2 = vld [vmem:[%s5549_s1 + $0x1e0] sm:$0xf]  ;;  %v2736_v3 = vor.u32 %v3588_v1, %v2735_v0  ;;  %v3620_v4 = vld [vmem:[%s5549_s1 + $0x1ec] sm:$0xf0]  ;;  %s2394_s18 = ssub.s32 (%p4022_p4), 5, %s4189_s15  ;;  %s3786_s28 = sshll.u32 (%p4022_p4), %s4010_s21, 5 }
  0x12   : > { %v2991_v5 = vld [vmem:[%s5549_s1 + $0x2e0] sm:$0xf]  ;;  %v3652_v6 = vld [vmem:[%s5549_s1 + $0x2ec] sm:$0xf0]  ;;  %v2864_v7 = vor.u32 %v3620_v4, %v2863_v2  ;;  %s3789_s23 = smul.u32 56, %s239_s11  ;;  %p2395_p8 = scmp.lt.s32.totalorder (%p4022_p4), %s2394_s18, 4 }
  0x13   : > { %v2992_v8 = vor.u32 %v3652_v6, %v2991_v5  ;;  %v3119_v9 = vld [vmem:[%s5549_s1 + $0x3e0] sm:$0xf]  ;;  %v3684_v10 = vld [vmem:[%s5549_s1 + $0x3ec] sm:$0xf0]  ;;  %1490 = vmatpush.bf16.msra.mxu0 %v2736_v3  ;;  %s5499_s6 = scalar_lea.vmem (%p4022_p4), %s5553_s5, %s3786_s28  }
  0x14   : > { %v2719_v11 = vld [vmem:[%s5549_s1 + $0xc0] sm:$0xf]  ;;  %v3120_v12 = vor.u32 %v3684_v10, %v3119_v9  ;;  %v3584_v13 = vld [vmem:[%s5549_s1 + $0xcc] sm:$0xf0]  ;;  %1509 = vmatpush.bf16.msra.mxu1 %v2864_v7  ;;  %s4241_s13 = scalar_lea.vmem %s5548_s0, %s3789_s23  ;;  %s5486_s23 = scalar_lea.vmem [#allocation2], %s2618_s27  }
  0x15   : > { %v2847_v14 = vld [vmem:[%s5549_s1 + $0x1c0] sm:$0xf]  ;;  %v3616_v15 = vld [vmem:[%s5549_s1 + $0x1cc] sm:$0xf0]  ;;  %1528 = vmatpush.bf16.msra.mxu2 %v2992_v8  ;;  %v2720_v16 = vor.u32 %v3584_v13, %v2719_v11 }
  0x16   : > { %v2848_v17 = vor.u32 %v3616_v15, %v2847_v14  ;;  %v2975_v18 = vld [vmem:[%s5549_s1 + $0x2c0] sm:$0xf]  ;;  %v3648_v19 = vld [vmem:[%s5549_s1 + $0x2cc] sm:$0xf0]  ;;  %1547 = vmatpush.bf16.msra.mxu3 %v3120_v12 }
  0x17   : > { %v3103_v20 = vld [vmem:[%s5549_s1 + $0x3c0] sm:$0xf]  ;;  %v2976_v21 = vor.u32 %v3648_v19, %v2975_v18  ;;  %v3680_v22 = vld [vmem:[%s5549_s1 + $0x3cc] sm:$0xf0]  ;;  %1491 = vmatpush.bf16.msra.mxu0 %v2720_v16 }
  0x18   : > { %v2703_v23 = vld [vmem:[%s5549_s1 + $0xa0] sm:$0xf]  ;;  %v3580_v24 = vld [vmem:[%s5549_s1 + $0xac] sm:$0xf0]  ;;  %v3104_v25 = vor.u32 %v3680_v22, %v3103_v20  ;;  %1510 = vmatpush.bf16.msra.mxu1 %v2848_v17 }
  0x19   : > { %v2831_v26 = vld [vmem:[%s5549_s1 + $0x1a0] sm:$0xf]  ;;  %v3612_v27 = vld [vmem:[%s5549_s1 + $0x1ac] sm:$0xf0]  ;;  %v2704_v29 = vor.u32 %v3580_v24, %v2703_v23  ;;  %1529 = vmatpush.bf16.msra.mxu2 %v2976_v21 }
  0x1a   : > { %v2959_v28 = vld [vmem:[%s5549_s1 + $0x2a0] sm:$0xf]  ;;  %v3644_v30 = vld [vmem:[%s5549_s1 + $0x2ac] sm:$0xf0]  ;;  %v2832_v33 = vor.u32 %v3612_v27, %v2831_v26  ;;  %1548 = vmatpush.bf16.msra.mxu3 %v3104_v25 }
  0x1b   : > { %v3087_v31 = vld [vmem:[%s5549_s1 + $0x3a0] sm:$0xf]  ;;  %v3676_v32 = vld [vmem:[%s5549_s1 + $0x3ac] sm:$0xf0]  ;;  %v2960_v34 = vor.u32 %v3644_v30, %v2959_v28  ;;  %1492 = vmatpush.bf16.msra.mxu0 %v2704_v29 }
  0x1c   : > { %v2687_v35 = vld [vmem:[%s5549_s1 + $0x80] sm:$0xf]  ;;  %v3576_v36 = vld [vmem:[%s5549_s1 + $0x8c] sm:$0xf0]  ;;  %v3088_v38 = vor.u32 %v3676_v32, %v3087_v31  ;;  %1511 = vmatpush.bf16.msra.mxu1 %v2832_v33 }
  0x1d   : > { %v2815_v37 = vld [vmem:[%s5549_s1 + $0x180] sm:$0xf]  ;;  %v3608_v39 = vld [vmem:[%s5549_s1 + $0x18c] sm:$0xf0]  ;;  %v2688_v44 = vor.u32 %v3576_v36, %v2687_v35  ;;  %1530 = vmatpush.bf16.msra.mxu2 %v2960_v34 }
  0x1e   : > { %v2943_v40 = vld [vmem:[%s5549_s1 + $0x280] sm:$0xf]  ;;  %v3640_v41 = vld [vmem:[%s5549_s1 + $0x28c] sm:$0xf0]  ;;  %v2816_v45 = vor.u32 %v3608_v39, %v2815_v37  ;;  %1549 = vmatpush.bf16.msra.mxu3 %v3088_v38  ;;  %v3586_v37 = vld [vmem:[%s5549_s1 + $0xe4] sm:$0xf] }
  0x1f   : > { %v3071_v42 = vld [vmem:[%s5549_s1 + $0x380] sm:$0xf]  ;;  %v3672_v43 = vld [vmem:[%s5549_s1 + $0x38c] sm:$0xf0]  ;;  %v2944_v46 = vor.u32 %v3640_v41, %v2943_v40  ;;  %1493 = vmatpush.bf16.msra.mxu0 %v2688_v44  ;;  %v2737_v38 = vld [vmem:[%s5549_s1 + $0xf0] sm:$0xf0] }
  0x20   : > { %v2671_v47 = vld [vmem:[%s5549_s1 + $0x60] sm:$0xf]  ;;  %v3572_v48 = vld [vmem:[%s5549_s1 + $0x6c] sm:$0xf0]  ;;  %v3072_v50 = vor.u32 %v3672_v43, %v3071_v42  ;;  %1512 = vmatpush.bf16.msra.mxu1 %v2816_v45  ;;  %v262_v41 = vld [vmem:[%s4241_s13 + $0x38] sm:$0xff] }
  0x21   : > { %v2799_v49 = vld [vmem:[%s5549_s1 + $0x160] sm:$0xf]  ;;  %v3604_v51 = vld [vmem:[%s5549_s1 + $0x16c] sm:$0xf0]  ;;  %v2672_v56 = vor.u32 %v3572_v48, %v2671_v47  ;;  %1531 = vmatpush.bf16.msra.mxu2 %v2944_v46  ;;  %v256_v42 = vld [vmem:[%s4241_s13 + $0x8] sm:$0xff] }
  0x22   : > { %v2927_v52 = vld [vmem:[%s5549_s1 + $0x260] sm:$0xf]  ;;  %v3636_v53 = vld [vmem:[%s5549_s1 + $0x26c] sm:$0xf0]  ;;  %v2800_v57 = vor.u32 %v3604_v51, %v2799_v49  ;;  %1550 = vmatpush.bf16.msra.mxu3 %v3072_v50  ;;  %v264_v48 = vld [vmem:[%s4241_s13 + $0x48] sm:$0xff] }
  0x23   : > { %v3055_v54 = vld [vmem:[%s5549_s1 + $0x360] sm:$0xf]  ;;  %v3668_v55 = vld [vmem:[%s5549_s1 + $0x36c] sm:$0xf0]  ;;  %v2928_v58 = vor.u32 %v3636_v53, %v2927_v52  ;;  %1494 = vmatpush.bf16.msra.mxu0 %v2672_v56  ;;  %v258_v52 = vld [vmem:[%s4241_s13 + $0x18] sm:$0xff] }
  0x24   : > { %v2655_v59 = vld [vmem:[%s5549_s1 + $0x40] sm:$0xf]  ;;  %v3568_v60 = vld [vmem:[%s5549_s1 + $0x4c] sm:$0xf0]  ;;  %v3056_v62 = vor.u32 %v3668_v55, %v3055_v54  ;;  %1513 = vmatpush.bf16.msra.mxu1 %v2800_v57  ;;  %v2740_v57 = vor.u32 %v3586_v37, %v2737_v38 }
  0x25   : > { %v2783_v61 = vld [vmem:[%s5549_s1 + $0x140] sm:$0xf]  ;;  %v3600_v63 = vld [vmem:[%s5549_s1 + $0x14c] sm:$0xf0]  ;;  %v2656_v4 = vor.u32 %v3568_v60, %v2655_v59  ;;  %1532 = vmatpush.bf16.msra.mxu2 %v2928_v58 }
  0x26   : > { %v2911_v0 = vld [vmem:[%s5549_s1 + $0x240] sm:$0xf]  ;;  %v3632_v1 = vld [vmem:[%s5549_s1 + $0x24c] sm:$0xf0]  ;;  %v2784_v6 = vor.u32 %v3600_v63, %v2783_v61  ;;  %1551 = vmatpush.bf16.msra.mxu3 %v3056_v62  ;;  %v3582_v61 = vld [vmem:[%s5549_s1 + $0xc4] sm:$0xf] }
  0x27   : > { %v3039_v2 = vld [vmem:[%s5549_s1 + $0x340] sm:$0xf]  ;;  %v3664_v3 = vld [vmem:[%s5549_s1 + $0x34c] sm:$0xf0]  ;;  %v2912_v7 = vor.u32 %v3632_v1, %v2911_v0  ;;  %1495 = vmatpush.bf16.msra.mxu0 %v2656_v4  ;;  %v2721_v62 = vld [vmem:[%s5549_s1 + $0xd0] sm:$0xf0] }
  0x28   : > { %v2639_v5 = vld [vmem:[%s5549_s1 + $0x20] sm:$0xf]  ;;  %v3564_v8 = vld [vmem:[%s5549_s1 + $0x2c] sm:$0xf0]  ;;  %v3040_v11 = vor.u32 %v3664_v3, %v3039_v2  ;;  %1514 = vmatpush.bf16.msra.mxu1 %v2784_v6  ;;  %v2724_v2 = vor.u32 %v3582_v61, %v2721_v62  ;;  %v3578_v6 = vld [vmem:[%s5549_s1 + $0xa4] sm:$0xf] }
  0x29   : > { %v2767_v9 = vld [vmem:[%s5549_s1 + $0x120] sm:$0xf]  ;;  %v3596_v10 = vld [vmem:[%s5549_s1 + $0x12c] sm:$0xf0]  ;;  %v2640_v16 = vor.u32 %v3564_v8, %v2639_v5  ;;  %1533 = vmatpush.bf16.msra.mxu2 %v2912_v7  ;;  %v2705_v7 = vld [vmem:[%s5549_s1 + $0xb0] sm:$0xf0] }
  0x2a   : > { %v2895_v12 = vld [vmem:[%s5549_s1 + $0x220] sm:$0xf]  ;;  %v3628_v13 = vld [vmem:[%s5549_s1 + $0x22c] sm:$0xf0]  ;;  %v2768_v20 = vor.u32 %v3596_v10, %v2767_v9  ;;  %1552 = vmatpush.bf16.msra.mxu3 %v3040_v11  ;;  %v3562_v62 = vld [vmem:[%s5549_s1 + $0x24] sm:$0xf] }
  0x2b   : > { %v3023_v14 = vld [vmem:[%s5549_s1 + $0x320] sm:$0xf]  ;;  %v3660_v15 = vld [vmem:[%s5549_s1 + $0x32c] sm:$0xf0]  ;;  %v2896_v21 = vor.u32 %v3628_v13, %v2895_v12  ;;  %1496 = vmatpush.bf16.msra.mxu0 %v2640_v16  ;;  %v2708_v12 = vor.u32 %v3578_v6, %v2705_v7 }
  0x2c   : > { %v2623_v17 = vld [vmem:[%s5549_s1] sm:$0xf]  ;;  %v3560_v18 = vld [vmem:[%s5549_s1 + $0xc] sm:$0xf0]  ;;  %v3024_v24 = vor.u32 %v3660_v15, %v3023_v14  ;;  %1515 = vmatpush.bf16.msra.mxu1 %v2768_v20  ;;  %v3574_v14 = vld [vmem:[%s5549_s1 + $0x84] sm:$0xf] }
  0x2d   : > { %v2751_v19 = vld [vmem:[%s5549_s1 + $0x100] sm:$0xf]  ;;  %v3592_v22 = vld [vmem:[%s5549_s1 + $0x10c] sm:$0xf0]  ;;  %v2624_v30 = vor.u32 %v3560_v18, %v2623_v17  ;;  %1534 = vmatpush.bf16.msra.mxu2 %v2896_v21  ;;  %v2689_v15 = vld [vmem:[%s5549_s1 + $0x90] sm:$0xf0] }
  0x2e   : > { %v2879_v23 = vld [vmem:[%s5549_s1 + $0x200] sm:$0xf]  ;;  %v3624_v25 = vld [vmem:[%s5549_s1 + $0x20c] sm:$0xf0]  ;;  %v2752_v34 = vor.u32 %v3592_v22, %v2751_v19  ;;  %1553 = vmatpush.bf16.msra.mxu3 %v3024_v24  ;;  %v276_v18 = vld [vmem:[%s4241_s13 + $0xa8] sm:$0xff] }
  0x2f   : > { %v3007_v26 = vld [vmem:[%s5549_s1 + $0x300] sm:$0xf]  ;;  %v3656_v27 = vld [vmem:[%s5549_s1 + $0x30c] sm:$0xf0]  ;;  %v2880_v35 = vor.u32 %v3624_v25, %v2879_v23  ;;  %1497 = vmatpush.bf16.msra.mxu0 %v2624_v30  ;;  %v270_v19 = vld [vmem:[%s4241_s13 + $0x78] sm:$0xff] }
  0x30   : > { %v3391_v28 = vld [vmem:[%s5549_s1 + $0x600] sm:$0xf]  ;;  %v3752_v29 = vld [vmem:[%s5549_s1 + $0x60c] sm:$0xf0]  ;;  %v3008_v39 = vor.u32 %v3656_v27, %v3007_v26  ;;  %1516 = vmatpush.bf16.msra.mxu1 %v2752_v34  ;;  %v278_v25 = vld [vmem:[%s4241_s13 + $0xb8] sm:$0xff]  ;;  %v2692_v27 = vor.u32 %v3574_v14, %v2689_v15 }
  0x31   : > { %v3247_v31 = vld [vmem:[%s5549_s1 + $0x4e0] sm:$0xf]  ;;  %v3748_v33 = vld [vmem:[%s5549_s1 + $0x5ec] sm:$0xf0]  ;;  %v3392_v43 = vor.u32 %v3752_v29, %v3391_v28  ;;  %1535 = vmatpush.bf16.msra.mxu2 %v2880_v35  ;;  %v272_v26 = vld [vmem:[%s4241_s13 + $0x88] sm:$0xff] }
  0x32   : > { %v3375_v32 = vld [vmem:[%s5549_s1 + $0x5e0] sm:$0xf]  ;;  %v3716_v36 = vld [vmem:[%s5549_s1 + $0x4ec] sm:$0xf0]  ;;  %1554 = vmatpush.bf16.msra.mxu3 %v3008_v39  ;;  %v2673_v34 = vld [vmem:[%s5549_s1 + $0x70] sm:$0xf0] }
  0x33   : > { %v255_v40 = vld [vmem:[%s4241_s13] sm:$0xff]  ;;  %v257_v47 = vld [vmem:[%s4241_s13 + $0x10] sm:$0xff]  ;;  %v3376_v49 = vor.u32 %v3748_v33, %v3375_v32  ;;  %v3248_v56 = vor.u32 %v3716_v36, %v3247_v31 }
  0x34   : > { %v3359_v44 = vld [vmem:[%s5549_s1 + $0x5c0] sm:$0xf]  ;;  %v4258_v45 = vpack.c.bf16 %v262_v41, %v255_v40  ;;  %v4265_v51 = vpack.c.bf16 %v264_v48, %v257_v47  ;;  %v265_v53 = vld [vmem:[%s4241_s13 + $0x50] sm:$0xff]  ;;  %v3570_v33 = vld [vmem:[%s5549_s1 + $0x64] sm:$0xf] }
  0x35   : > { %v263_v46 = vld [vmem:[%s4241_s13 + $0x40] sm:$0xff]  ;;  %v3744_v54 = vld [vmem:[%s5549_s1 + $0x5cc] sm:$0xf0]  ;;  %v4272_v55 = vpack.c.bf16 %v265_v53, %v258_v52  ;;  %1611 = vmatpush.bf16.msrb.mxu2 %v3392_v43  ;;  %1585 = vmatpush.bf16.msrb.mxu1 %v3376_v49  ;;  %v3121_v40 = vld [vmem:[%s5549_s1 + $0x3f0] sm:$0xf0]  ;;  %v2676_v43 = vor.u32 %v3570_v33, %v2673_v34 }
  0x36   : > { %v4263_v50 = vpack.c.bf16 %v263_v46, %v256_v42  ;;  %v3231_v58 = vld [vmem:[%s5549_s1 + $0x4c0] sm:$0xf]  ;;  %v3712_v59 = vld [vmem:[%s5549_s1 + $0x4cc] sm:$0xf0]  ;;  %1498 = vmatmul.bf16.vlgmr.msra.gmra.mxu0 %v4258_v45  ;;  %v3360_v60 = vor.u32 %v3744_v54, %v3359_v44  ;;  %1536 = vmatmul.bf16.vlgmr.msra.gmra.mxu2 %v4265_v51  ;;  %v3682_v35 = vld [vmem:[%s5549_s1 + $0x3e4] sm:$0xf] }
  0x37   : > { %v3343_v63 = vld [vmem:[%s5549_s1 + $0x5a0] sm:$0xf]  ;;  %v3740_v0 = vld [vmem:[%s5549_s1 + $0x5ac] sm:$0xf0]  ;;  %1555 = vmatmul.bf16.vlgmr.msra.gmra.mxu3 %v4272_v55  ;;  %1566 = vmatpush.bf16.msrb.mxu0 %v3248_v56  ;;  %v3232_v1 = vor.u32 %v3712_v59, %v3231_v58  ;;  %v3566_v47 = vld [vmem:[%s5549_s1 + $0x44] sm:$0xf]  ;;  %v3124_v48 = vor.u32 %v3682_v35, %v3121_v40 }
  0x38   : > { %1517 = vmatmul.bf16.vlgmr.msra.gmra.mxu1 %v4263_v50  ;;  %1623 = vmatpush.bf16.msrb.mxu3 %v2740_v57  ;;  %v3215_v3 = vld [vmem:[%s5549_s1 + $0x4a0] sm:$0xf]  ;;  %v3708_v4 = vld [vmem:[%s5549_s1 + $0x4ac] sm:$0xf0]  ;;  %v3344_v5 = vor.u32 %v3740_v0, %v3343_v63  ;;  %v2657_v52 = vld [vmem:[%s5549_s1 + $0x50] sm:$0xf0] }
  0x39   : > { %1586 = vmatpush.bf16.msrb.mxu1 %v3360_v60  ;;  %v3327_v8 = vld [vmem:[%s5549_s1 + $0x580] sm:$0xf]  ;;  %v3736_v9 = vld [vmem:[%s5549_s1 + $0x58c] sm:$0xf0]  ;;  %v3216_v10 = vor.u32 %v3708_v4, %v3215_v3  ;;  %v3678_v53 = vld [vmem:[%s5549_s1 + $0x3c4] sm:$0xf]  ;;  %v2660_v59 = vor.u32 %v3566_v47, %v2657_v52  ;;  %1680 = vmatpush.bf16.msra.mxu2 %v3124_v48 }
  0x3a   : > { %v3199_v11 = vld [vmem:[%s5549_s1 + $0x480] sm:$0xf]  ;;  %v3704_v13 = vld [vmem:[%s5549_s1 + $0x48c] sm:$0xf0]  ;;  %v3328_v16 = vor.u32 %v3736_v9, %v3327_v8  ;;  %v3105_v54 = vld [vmem:[%s5549_s1 + $0x3d0] sm:$0xf0] }
  0x3b   : > { %1567 = vmatpush.bf16.msrb.mxu0 %v3232_v1  ;;  %v269_v17 = vld [vmem:[%s4241_s13 + $0x70] sm:$0xff]  ;;  %v3311_v21 = vld [vmem:[%s5549_s1 + $0x560] sm:$0xf]  ;;  %v3200_v23 = vor.u32 %v3704_v13, %v3199_v11  ;;  %v3108_v63 = vor.u32 %v3678_v53, %v3105_v54  ;;  %v3650_v8 = vld [vmem:[%s5549_s1 + $0x2e4] sm:$0xf] }
  0x3c   : > { %1624 = vmatpush.bf16.msrb.mxu3 %v2724_v2  ;;  %v277_v20 = vld [vmem:[%s4241_s13 + $0xb0] sm:$0xff]  ;;  %v271_v24 = vld [vmem:[%s4241_s13 + $0x80] sm:$0xff]  ;;  %v4346_v31 = vpack.c.bf16 %v276_v18, %v269_v17  ;;  %v266_v17 = vld [vmem:[%s4241_s13 + $0x58] sm:$0xff] }
  0x3d   : > { %1587 = vmatpush.bf16.msrb.mxu1 %v3344_v5  ;;  %v3732_v22 = vld [vmem:[%s5549_s1 + $0x56c] sm:$0xf0]  ;;  %v279_v28 = vld [vmem:[%s4241_s13 + $0xc0] sm:$0xff]  ;;  %v4357_v36 = vpack.c.bf16 %v277_v20, %v270_v19  ;;  %v4359_v37 = vpack.c.bf16 %v278_v25, %v271_v24  ;;  %v2641_v1 = vld [vmem:[%s5549_s1 + $0x30] sm:$0xf0]  ;;  %1681 = vmatpush.bf16.msra.mxu2 %v3108_v63 }
  0x3e   : > { %v3183_v29 = vld [vmem:[%s5549_s1 + $0x460] sm:$0xf]  ;;  %v3700_v30 = vld [vmem:[%s5549_s1 + $0x46c] sm:$0xf0]  ;;  %v3312_v32 = vor.u32 %v3732_v22, %v3311_v21  ;;  %v4370_v41 = vpack.c.bf16 %v279_v28, %v272_v26  ;;  %v3674_v2 = vld [vmem:[%s5549_s1 + $0x3a4] sm:$0xf] }
  0x3f   : > { %1568 = vmatpush.bf16.msrb.mxu0 %v3216_v10  ;;  %v3295_v38 = vld [vmem:[%s5549_s1 + $0x540] sm:$0xf]  ;;  %v3728_v39 = vld [vmem:[%s5549_s1 + $0x54c] sm:$0xf0]  ;;  %v3184_v42 = vor.u32 %v3700_v30, %v3183_v29  ;;  %v3089_v3 = vld [vmem:[%s5549_s1 + $0x3b0] sm:$0xf0]  ;;  %v2644_v10 = vor.u32 %v3562_v62, %v2641_v1 }
  0x40   : > { %1625 = vmatpush.bf16.msrb.mxu3 %v2708_v12  ;;  %v3167_v44 = vld [vmem:[%s5549_s1 + $0x440] sm:$0xf]  ;;  %v3696_v46 = vld [vmem:[%s5549_s1 + $0x44c] sm:$0xf0]  ;;  %v3296_v49 = vor.u32 %v3728_v39, %v3295_v38  ;;  %v2993_v9 = vld [vmem:[%s5549_s1 + $0x2f0] sm:$0xf0]  ;;  %v3092_v14 = vor.u32 %v3674_v2, %v3089_v3 }
  0x41   : > { %1588 = vmatpush.bf16.msrb.mxu1 %v3328_v16  ;;  %v3279_v56 = vld [vmem:[%s5549_s1 + $0x520] sm:$0xf]  ;;  %v3724_v57 = vld [vmem:[%s5549_s1 + $0x52c] sm:$0xf0]  ;;  %v3168_v58 = vor.u32 %v3696_v46, %v3167_v44  ;;  %v3558_v12 = vld [vmem:[%s5549_s1 + $0x4] sm:$0xf]  ;;  %v2996_v21 = vor.u32 %v3650_v8, %v2993_v9 }
  0x42   : > { %v3151_v60 = vld [vmem:[%s5549_s1 + $0x420] sm:$0xf]  ;;  %v3692_v61 = vld [vmem:[%s5549_s1 + $0x42c] sm:$0xf0]  ;;  %v3280_v0 = vor.u32 %v3724_v57, %v3279_v56  ;;  %v2625_v13 = vld [vmem:[%s5549_s1 + $0x10] sm:$0xf0]  ;;  %1682 = vmatpush.bf16.msra.mxu2 %v3092_v14 }
  0x43   : > { %1569 = vmatpush.bf16.msrb.mxu0 %v3200_v23  ;;  %v3263_v4 = vld [vmem:[%s5549_s1 + $0x500] sm:$0xf]  ;;  %v3720_v5 = vld [vmem:[%s5549_s1 + $0x50c] sm:$0xf0]  ;;  %v3152_v6 = vor.u32 %v3692_v61, %v3151_v60  ;;  %v3618_v18 = vld [vmem:[%s5549_s1 + $0x1e4] sm:$0xf]  ;;  %v2628_v29 = vor.u32 %v3558_v12, %v2625_v13 }
  0x44   : > { %1626 = vmatpush.bf16.msrb.mxu3 %v2692_v27  ;;  %v3135_v7 = vld [vmem:[%s5549_s1 + $0x400] sm:$0xf]  ;;  %v3688_v11 = vld [vmem:[%s5549_s1 + $0x40c] sm:$0xf0]  ;;  %v3264_v15 = vor.u32 %v3720_v5, %v3263_v4  ;;  %v2865_v19 = vld [vmem:[%s5549_s1 + $0x1f0] sm:$0xf0] }
  0x45   : > { %1589 = vmatpush.bf16.msrb.mxu1 %v3312_v32  ;;  %v259_v16 = vld [vmem:[%s4241_s13 + $0x20] sm:$0xff]  ;;  %v3249_v22 = vld [vmem:[%s5549_s1 + $0x4f0] sm:$0xf0]  ;;  %v3136_v25 = vor.u32 %v3688_v11, %v3135_v7  ;;  %v260_v26 = vld [vmem:[%s4241_s13 + $0x28] sm:$0xff]  ;;  %v2868_v32 = vor.u32 %v3618_v18, %v2865_v19 }
  0x46   : > { %1503 = vmatmul.bf16.gmra.mxu0 %v4346_v31  ;;  %1541 = vmatmul.bf16.gmra.mxu2 %v4359_v37  ;;  %v3714_v20 = vld [vmem:[%s5549_s1 + $0x4e4] sm:$0xf]  ;;  %v3073_v24 = vld [vmem:[%s5549_s1 + $0x390] sm:$0xf0]  ;;  %v268_v30 = vld [vmem:[%s4241_s13 + $0x68] sm:$0xff] }
  0x47   : > { %1560 = vmatmul.bf16.gmra.mxu3 %v4370_v41  ;;  %1570 = vmatpush.bf16.msrb.mxu0 %v3184_v42  ;;  %v3670_v23 = vld [vmem:[%s5549_s1 + $0x384] sm:$0xf]  ;;  %v261_v28 = vld [vmem:[%s4241_s13 + $0x30] sm:$0xff]  ;;  %v3252_v35 = vor.u32 %v3714_v20, %v3249_v22  ;;  %v280_v19 = vld [vmem:[%s4241_s13 + $0xc8] sm:$0xff] }
  0x48   : > { %1522 = vmatmul.bf16.gmra.mxu1 %v4357_v36  ;;  %1627 = vmatpush.bf16.msrb.mxu3 %v2676_v43  ;;  %v267_v27 = vld [vmem:[%s4241_s13 + $0x60] sm:$0xff]  ;;  %v2849_v34 = vld [vmem:[%s5549_s1 + $0x1d0] sm:$0xf0]  ;;  %v3076_v42 = vor.u32 %v3670_v23, %v3073_v24  ;;  %v4481_v43 = vpack.c.bf16 %v266_v17, %v259_v16  ;;  %v274_v20 = vld [vmem:[%s4241_s13 + $0x98] sm:$0xff] }
  0x49   : > { %1590 = vmatpush.bf16.msrb.mxu1 %v3296_v49  ;;  %v3614_v33 = vld [vmem:[%s5549_s1 + $0x1c4] sm:$0xf]  ;;  %v2977_v39 = vld [vmem:[%s5549_s1 + $0x2d0] sm:$0xf0]  ;;  %v4483_v44 = vpack.c.bf16 %v267_v27, %v260_v26  ;;  %v4494_v49 = vpack.c.bf16 %v268_v30, %v261_v28  ;;  %v282_v30 = vld [vmem:[%s4241_s13 + $0xd8] sm:$0xff] }
  0x4a   : > { %v3646_v38 = vld [vmem:[%s5549_s1 + $0x2c4] sm:$0xf]  ;;  %v3233_v46 = vld [vmem:[%s5549_s1 + $0x4d0] sm:$0xf0]  ;;  %v2852_v52 = vor.u32 %v3614_v33, %v2849_v34  ;;  %1683 = vmatpush.bf16.msra.mxu2 %v3076_v42 }
  0x4b   : > { %1571 = vmatpush.bf16.msrb.mxu0 %v3168_v58  ;;  %v3710_v40 = vld [vmem:[%s5549_s1 + $0x4c4] sm:$0xf]  ;;  %v3057_v48 = vld [vmem:[%s5549_s1 + $0x370] sm:$0xf0]  ;;  %v2980_v53 = vor.u32 %v3646_v38, %v2977_v39 }
  0x4c   : > { %1628 = vmatpush.bf16.msrb.mxu3 %v2660_v59  ;;  %v3666_v47 = vld [vmem:[%s5549_s1 + $0x364] sm:$0xf]  ;;  %v2833_v56 = vld [vmem:[%s5549_s1 + $0x1b0] sm:$0xf0]  ;;  %v3236_v57 = vor.u32 %v3710_v40, %v3233_v46 }
  0x4d   : > { %1591 = vmatpush.bf16.msrb.mxu1 %v3280_v0  ;;  %v3610_v54 = vld [vmem:[%s5549_s1 + $0x1a4] sm:$0xf]  ;;  %v2961_v59 = vld [vmem:[%s5549_s1 + $0x2b0] sm:$0xf0]  ;;  %v3060_v61 = vor.u32 %v3666_v47, %v3057_v48 }
  0x4e   : > { %v3642_v58 = vld [vmem:[%s5549_s1 + $0x2a4] sm:$0xf]  ;;  %v3217_v62 = vld [vmem:[%s5549_s1 + $0x4b0] sm:$0xf0]  ;;  %v2836_v1 = vor.u32 %v3610_v54, %v2833_v56  ;;  %v3589_v54 = vld [vmem:[%s5549_s1 + $0xf4] sm:$0xf0] }
  0x4f   : > { %1572 = vmatpush.bf16.msrb.mxu0 %v3152_v6  ;;  %v3706_v60 = vld [vmem:[%s5549_s1 + $0x4a4] sm:$0xf]  ;;  %v3041_v0 = vld [vmem:[%s5549_s1 + $0x350] sm:$0xf0]  ;;  %v2964_v2 = vor.u32 %v3642_v58, %v2961_v59  ;;  %1684 = vmatpush.bf16.msra.mxu2 %v3060_v61 }
  0x50   : > { %1629 = vmatpush.bf16.msrb.mxu3 %v2644_v10  ;;  %v3662_v63 = vld [vmem:[%s5549_s1 + $0x344] sm:$0xf]  ;;  %v2817_v4 = vld [vmem:[%s5549_s1 + $0x190] sm:$0xf0]  ;;  %v3220_v5 = vor.u32 %v3706_v60, %v3217_v62 }
  0x51   : > { %1592 = vmatpush.bf16.msrb.mxu1 %v3264_v15  ;;  %v3606_v3 = vld [vmem:[%s5549_s1 + $0x184] sm:$0xf]  ;;  %v2945_v7 = vld [vmem:[%s5549_s1 + $0x290] sm:$0xf0]  ;;  %v3044_v9 = vor.u32 %v3662_v63, %v3041_v0 }
  0x52   : > { %v3638_v6 = vld [vmem:[%s5549_s1 + $0x284] sm:$0xf]  ;;  %v3201_v10 = vld [vmem:[%s5549_s1 + $0x490] sm:$0xf0]  ;;  %v2820_v13 = vor.u32 %v3606_v3, %v2817_v4  ;;  %v2727_v3 = vld [vmem:[%s5549_s1 + $0xc8] sm:$0xf] }
  0x53   : > { %1573 = vmatpush.bf16.msrb.mxu0 %v3136_v25  ;;  %v3702_v8 = vld [vmem:[%s5549_s1 + $0x484] sm:$0xf]  ;;  %v3025_v12 = vld [vmem:[%s5549_s1 + $0x330] sm:$0xf0]  ;;  %v2948_v14 = vor.u32 %v3638_v6, %v2945_v7  ;;  %1685 = vmatpush.bf16.msra.mxu2 %v3044_v9  ;;  %v3585_v4 = vld [vmem:[%s5549_s1 + $0xd4] sm:$0xf0] }
  0x54   : > { %1630 = vmatpush.bf16.msrb.mxu3 %v2628_v29  ;;  %v3658_v11 = vld [vmem:[%s5549_s1 + $0x324] sm:$0xf]  ;;  %v2801_v16 = vld [vmem:[%s5549_s1 + $0x170] sm:$0xf0]  ;;  %v3204_v17 = vor.u32 %v3702_v8, %v3201_v10 }
  0x55   : > { %1661 = vmatpush.bf16.msra.mxu1 %v2996_v21  ;;  %v3602_v15 = vld [vmem:[%s5549_s1 + $0x164] sm:$0xf]  ;;  %v273_v18 = vld [vmem:[%s4241_s13 + $0x90] sm:$0xff]  ;;  %v3028_v24 = vor.u32 %v3658_v11, %v3025_v12 }
  0x56   : > { %1574 = vmatmul.bf16.vlgmr.msrb.gmra.mxu0 %v4481_v43  ;;  %3405 = vmatmul.msk.bf16.vlgmr.msrb.gmra.mxu2 %vm1483_vm0, %v4494_v49  ;;  %v3634_v21 = vld [vmem:[%s5549_s1 + $0x264] sm:$0xf]  ;;  %v2929_v22 = vld [vmem:[%s5549_s1 + $0x270] sm:$0xf0]  ;;  %v4594_v47 = vpack.c.bf16 %v280_v19, %v273_v18  ;;  %v3621_v18 = vld [vmem:[%s5549_s1 + $0x1f4] sm:$0xf0] }
  0x57   : > { %1642 = vmatpush.bf16.msra.mxu0 %v2868_v32  ;;  %1631 = vmatmul.bf16.vlgmr.msrb.gmra.mxu3 %v4258_v45  ;;  %v3698_v23 = vld [vmem:[%s5549_s1 + $0x464] sm:$0xf]  ;;  %v3185_v25 = vld [vmem:[%s5549_s1 + $0x470] sm:$0xf0]  ;;  %v2804_v32 = vor.u32 %v3602_v15, %v2801_v16  ;;  %v2932_v33 = vor.u32 %v3634_v21, %v2929_v22 }
  0x58   : > { %1699 = vmatpush.bf16.msra.mxu3 %v3252_v35  ;;  %1593 = vmatmul.bf16.vlgmr.msrb.gmra.mxu1 %v4483_v44  ;;  %v3654_v26 = vld [vmem:[%s5549_s1 + $0x304] sm:$0xf]  ;;  %v3009_v27 = vld [vmem:[%s5549_s1 + $0x310] sm:$0xf0]  ;;  %v3188_v39 = vor.u32 %v3698_v23, %v3185_v25  ;;  %v2711_v23 = vld [vmem:[%s5549_s1 + $0xa8] sm:$0xf] }
  0x59   : > { %1662 = vmatpush.bf16.msra.mxu1 %v2980_v53  ;;  %v281_v28 = vld [vmem:[%s4241_s13 + $0xd0] sm:$0xff]  ;;  %v275_v29 = vld [vmem:[%s4241_s13 + $0xa0] sm:$0xff]  ;;  %1686 = vmatpush.bf16.msra.mxu2 %v3028_v24  ;;  %v3012_v46 = vor.u32 %v3654_v26, %v3009_v27  ;;  %v2743_v53 = vld [vmem:[%s5549_s1 + $0xe8] sm:$0xf] }
  0x5a   : > { %v3598_v34 = vld [vmem:[%s5549_s1 + $0x144] sm:$0xf]  ;;  %v2785_v35 = vld [vmem:[%s5549_s1 + $0x150] sm:$0xf0]  ;;  %v4596_v48 = vpack.c.bf16 %v281_v28, %v274_v20  ;;  %v4607_v56 = vpack.c.bf16 %v282_v30, %v275_v29  ;;  %v3581_v24 = vld [vmem:[%s5549_s1 + $0xb4] sm:$0xf0] }
  0x5b   : > { %1643 = vmatpush.bf16.msra.mxu0 %v2852_v52  ;;  %v3630_v38 = vld [vmem:[%s5549_s1 + $0x244] sm:$0xf]  ;;  %v2913_v40 = vld [vmem:[%s5549_s1 + $0x250] sm:$0xf0] }
  0x5c   : > { %1700 = vmatpush.bf16.msra.mxu3 %v3236_v57  ;;  %v3694_v42 = vld [vmem:[%s5549_s1 + $0x444] sm:$0xf]  ;;  %v3169_v52 = vld [vmem:[%s5549_s1 + $0x450] sm:$0xf0]  ;;  %v2788_v57 = vor.u32 %v3598_v34, %v2785_v35  ;;  %v2916_v58 = vor.u32 %v3630_v38, %v2913_v40  ;;  %v3617_v35 = vld [vmem:[%s5549_s1 + $0x1d4] sm:$0xf0] }
  0x5d   : > { %1663 = vmatpush.bf16.msra.mxu1 %v2964_v2  ;;  %v3594_v59 = vld [vmem:[%s5549_s1 + $0x124] sm:$0xf]  ;;  %v2769_v60 = vld [vmem:[%s5549_s1 + $0x130] sm:$0xf0]  ;;  %v3172_v61 = vor.u32 %v3694_v42, %v3169_v52  ;;  %1687 = vmatpush.bf16.msra.mxu2 %v3012_v46  ;;  %v2695_v38 = vld [vmem:[%s5549_s1 + $0x88] sm:$0xf] }
  0x5e   : > { %v3626_v62 = vld [vmem:[%s5549_s1 + $0x224] sm:$0xf]  ;;  %v2897_v63 = vld [vmem:[%s5549_s1 + $0x230] sm:$0xf0]  ;;  %v2839_v52 = vld [vmem:[%s5549_s1 + $0x1a8] sm:$0xf] }
  0x5f   : > { %1644 = vmatpush.bf16.msra.mxu0 %v2836_v1  ;;  %v3690_v0 = vld [vmem:[%s5549_s1 + $0x424] sm:$0xf]  ;;  %v2744_v1 = vor.u32 %v3589_v54, %v2743_v53  ;;  %v3153_v2 = vld [vmem:[%s5549_s1 + $0x430] sm:$0xf0]  ;;  %v2900_v6 = vor.u32 %v3626_v62, %v2897_v63  ;;  %v3613_v53 = vld [vmem:[%s5549_s1 + $0x1b4] sm:$0xf0] }
  0x60   : > { %1701 = vmatpush.bf16.msra.mxu3 %v3220_v5  ;;  %v2772_v5 = vor.u32 %v3594_v59, %v2769_v60  ;;  %v3590_v7 = vld [vmem:[%s5549_s1 + $0x104] sm:$0xf]  ;;  %v2753_v8 = vld [vmem:[%s5549_s1 + $0x110] sm:$0xf0]  ;;  %v3156_v10 = vor.u32 %v3690_v0, %v3153_v2  ;;  %v2679_v59 = vld [vmem:[%s5549_s1 + $0x68] sm:$0xf] }
  0x61   : > { %1664 = vmatpush.bf16.msra.mxu1 %v2948_v14  ;;  %v3622_v9 = vld [vmem:[%s5549_s1 + $0x204] sm:$0xf]  ;;  %v2881_v11 = vld [vmem:[%s5549_s1 + $0x210] sm:$0xf0]  ;;  %1756 = vmatpush.bf16.msrb.mxu2 %v2744_v1  ;;  %v2728_v14 = vor.u32 %v3585_v4, %v2727_v3  ;;  %v2756_v21 = vor.u32 %v3590_v7, %v2753_v8  ;;  %v3573_v60 = vld [vmem:[%s5549_s1 + $0x74] sm:$0xf0]  ;;  %v2840_v1 = vor.u32 %v3613_v53, %v2839_v52 }
  0x62   : > { %v3686_v12 = vld [vmem:[%s5549_s1 + $0x404] sm:$0xf]  ;;  %v3377_v16 = vld [vmem:[%s5549_s1 + $0x5f0] sm:$0xf0]  ;;  %v2884_v22 = vor.u32 %v3622_v9, %v2881_v11  ;;  %v3127_v62 = vld [vmem:[%s5549_s1 + $0x3e8] sm:$0xf]  ;;  %v2680_v4 = vor.u32 %v3573_v60, %v2679_v59 }
  0x63   : > { %1645 = vmatpush.bf16.msra.mxu0 %v2820_v13  ;;  %v3137_v13 = vld [vmem:[%s5549_s1 + $0x410] sm:$0xf0]  ;;  %v3746_v15 = vld [vmem:[%s5549_s1 + $0x5e4] sm:$0xf]  ;;  %v3685_v63 = vld [vmem:[%s5549_s1 + $0x3f4] sm:$0xf0] }
  0x64   : > { %1702 = vmatpush.bf16.msra.mxu3 %v3204_v17  ;;  %v2871_v17 = vld [vmem:[%s5549_s1 + $0x1e8] sm:$0xf]  ;;  %v3750_v19 = vld [vmem:[%s5549_s1 + $0x604] sm:$0xf]  ;;  %v3393_v20 = vld [vmem:[%s5549_s1 + $0x610] sm:$0xf0]  ;;  %v3140_v25 = vor.u32 %v3686_v12, %v3137_v13  ;;  %v3380_v26 = vor.u32 %v3746_v15, %v3377_v16  ;;  %v3128_v0 = vor.u32 %v3685_v63, %v3127_v62 }
  0x65   : > { %1665 = vmatpush.bf16.msra.mxu1 %v2932_v33  ;;  %1757 = vmatpush.bf16.msrb.mxu2 %v2728_v14  ;;  %v2872_v27 = vor.u32 %v3621_v18, %v2871_v17  ;;  %v3396_v28 = vor.u32 %v3750_v19, %v3393_v20  ;;  %v3742_v29 = vld [vmem:[%s5549_s1 + $0x5c4] sm:$0xf]  ;;  %v3361_v30 = vld [vmem:[%s5549_s1 + $0x5d0] sm:$0xf0]  ;;  %v2855_v33 = vld [vmem:[%s5549_s1 + $0x1c8] sm:$0xf] }
  0x66   : > { %1579 = vmatmul.bf16.gmra.mxu0 %v4594_v47  ;;  %3406 = vmatmul.msk.bf16.gmra.mxu2 %vm1483_vm0, %v4607_v56  ;;  %v3364_v34 = vor.u32 %v3742_v29, %v3361_v30  ;;  %v3738_v40 = vld [vmem:[%s5549_s1 + $0x5a4] sm:$0xf]  ;;  %v3345_v42 = vld [vmem:[%s5549_s1 + $0x5b0] sm:$0xf0]  ;;  %v2856_v46 = vor.u32 %v3617_v35, %v2855_v33  ;;  %v2823_v2 = vld [vmem:[%s5549_s1 + $0x188] sm:$0xf] }
  0x67   : > { %1646 = vmatpush.bf16.msra.mxu0 %v2804_v32  ;;  %1636 = vmatmul.bf16.gmra.mxu3 %v4346_v31  ;;  %v2712_v32 = vor.u32 %v3581_v24, %v2711_v23  ;;  %v3609_v3 = vld [vmem:[%s5549_s1 + $0x194] sm:$0xf0]  ;;  %v3111_v8 = vld [vmem:[%s5549_s1 + $0x3c8] sm:$0xf]  ;;  %v3313_v11 = vld [vmem:[%s5549_s1 + $0x570] sm:$0xf0] }
  0x68   : > { %1703 = vmatpush.bf16.msra.mxu3 %v3188_v39  ;;  %1598 = vmatmul.bf16.gmra.mxu1 %v4596_v48  ;;  %v3577_v39 = vld [vmem:[%s5549_s1 + $0x94] sm:$0xf0]  ;;  %v3095_v13 = vld [vmem:[%s5549_s1 + $0x3a8] sm:$0xf]  ;;  %v2824_v14 = vor.u32 %v3609_v3, %v2823_v2  ;;  %v3726_v20 = vld [vmem:[%s5549_s1 + $0x544] sm:$0xf] }
  0x69   : > { %1666 = vmatpush.bf16.msra.mxu1 %v2916_v58  ;;  %1758 = vmatpush.bf16.msrb.mxu2 %v2712_v32  ;;  %v2696_v54 = vor.u32 %v3577_v39, %v2695_v38  ;;  %v3734_v58 = vld [vmem:[%s5549_s1 + $0x584] sm:$0xf]  ;;  %v3569_v7 = vld [vmem:[%s5549_s1 + $0x54] sm:$0xf0]  ;;  %v2807_v15 = vld [vmem:[%s5549_s1 + $0x168] sm:$0xf] }
  0x6a   : > { %v3681_v9 = vld [vmem:[%s5549_s1 + $0x3d4] sm:$0xf0]  ;;  %v3297_v24 = vld [vmem:[%s5549_s1 + $0x550] sm:$0xf0]  ;;  %v3722_v33 = vld [vmem:[%s5549_s1 + $0x524] sm:$0xf] }
  0x6b   : > { %1647 = vmatpush.bf16.msra.mxu0 %v2788_v57  ;;  %v3348_v57 = vor.u32 %v3738_v40, %v3345_v42  ;;  %v3112_v12 = vor.u32 %v3681_v9, %v3111_v8  ;;  %v3605_v16 = vld [vmem:[%s5549_s1 + $0x174] sm:$0xf0]  ;;  %v3300_v32 = vor.u32 %v3726_v20, %v3297_v24  ;;  %v3281_v39 = vld [vmem:[%s5549_s1 + $0x530] sm:$0xf0]  ;;  %v3255_v40 = vld [vmem:[%s5549_s1 + $0x4e8] sm:$0xf] }
  0x6c   : > { %1704 = vmatpush.bf16.msra.mxu3 %v3172_v61  ;;  %v3329_v61 = vld [vmem:[%s5549_s1 + $0x590] sm:$0xf0]  ;;  %v3677_v18 = vld [vmem:[%s5549_s1 + $0x3b4] sm:$0xf0]  ;;  %v2775_v52 = vld [vmem:[%s5549_s1 + $0x128] sm:$0xf] }
  0x6d   : > { %1667 = vmatpush.bf16.msra.mxu1 %v2900_v6  ;;  %1759 = vmatpush.bf16.msrb.mxu2 %v2696_v54  ;;  %v3332_v6 = vor.u32 %v3734_v58, %v3329_v61  ;;  %v3096_v23 = vor.u32 %v3677_v18, %v3095_v13  ;;  %v3601_v29 = vld [vmem:[%s5549_s1 + $0x154] sm:$0xf0]  ;;  %v3718_v58 = vld [vmem:[%s5549_s1 + $0x504] sm:$0xf]  ;;  %v3265_v59 = vld [vmem:[%s5549_s1 + $0x510] sm:$0xf0] }
  0x6e   : > { %v3561_v35 = vld [vmem:[%s5549_s1 + $0x14] sm:$0xf0]  ;;  %v3239_v61 = vld [vmem:[%s5549_s1 + $0x4c8] sm:$0xf] }
  0x6f   : > { %1648 = vmatpush.bf16.msra.mxu0 %v2772_v5  ;;  %v2663_v5 = vld [vmem:[%s5549_s1 + $0x48] sm:$0xf]  ;;  %v3717_v42 = vld [vmem:[%s5549_s1 + $0x4f4] sm:$0xf0] }
  0x70   : > { %1705 = vmatpush.bf16.msra.mxu3 %v3156_v10  ;;  %v3730_v10 = vld [vmem:[%s5549_s1 + $0x564] sm:$0xf]  ;;  %v2664_v17 = vor.u32 %v3569_v7, %v2663_v5  ;;  %v3597_v53 = vld [vmem:[%s5549_s1 + $0x134] sm:$0xf0]  ;;  %v3256_v60 = vor.u32 %v3717_v42, %v3255_v40  ;;  %v3063_v63 = vld [vmem:[%s5549_s1 + $0x368] sm:$0xf]  ;;  %v3268_v7 = vor.u32 %v3718_v58, %v3265_v59 }
  0x71   : > { %1668 = vmatpush.bf16.msra.mxu1 %v2884_v22  ;;  %1760 = vmatpush.bf16.msrb.mxu2 %v2680_v4  ;;  %v3316_v19 = vor.u32 %v3730_v10, %v3313_v11  ;;  %v3565_v22 = vld [vmem:[%s5549_s1 + $0x34] sm:$0xf0]  ;;  %v2776_v4 = vor.u32 %v3597_v53, %v2775_v52  ;;  %v2759_v5 = vld [vmem:[%s5549_s1 + $0x108] sm:$0xf] }
  0x72   : > { %v3713_v62 = vld [vmem:[%s5549_s1 + $0x4d4] sm:$0xf0]  ;;  %v3383_v8 = vld [vmem:[%s5549_s1 + $0x5e8] sm:$0xf] }
  0x73   : > { %1649 = vmatpush.bf16.msra.mxu0 %v2756_v21  ;;  %v2647_v21 = vld [vmem:[%s5549_s1 + $0x28] sm:$0xf]  ;;  %v3653_v2 = vld [vmem:[%s5549_s1 + $0x2f4] sm:$0xf0]  ;;  %v3240_v9 = vor.u32 %v3713_v62, %v3239_v61  ;;  %v3587_v62 = vld [vmem:[%s5549_s1 + $0xec] sm:$0xf] }
  0x74   : > { %1706 = vmatpush.bf16.msra.mxu3 %v3140_v25  ;;  %v3079_v25 = vld [vmem:[%s5549_s1 + $0x388] sm:$0xf]  ;;  %v2648_v30 = vor.u32 %v3565_v22, %v2647_v21  ;;  %v3665_v11 = vld [vmem:[%s5549_s1 + $0x354] sm:$0xf0] }
  0x75   : > { %1744 = vmatpush.bf16.msrb.mxu1 %v3396_v28  ;;  %1761 = vmatpush.bf16.msrb.mxu2 %v2664_v17  ;;  %v2791_v28 = vld [vmem:[%s5549_s1 + $0x148] sm:$0xf]  ;;  %v3749_v13 = vld [vmem:[%s5549_s1 + $0x5f4] sm:$0xf0] }
  0x76   : > { %1650 = vmatmul.bf16.vlgmr.msra.gmra.mxu0 %v4263_v50  ;;  %1688 = vmatmul.bf16.vlgmr.msra.gmra.mxu2 %v4272_v55  ;;  %v3047_v10 = vld [vmem:[%s5549_s1 + $0x348] sm:$0xf]  ;;  %v3649_v18 = vld [vmem:[%s5549_s1 + $0x2d4] sm:$0xf0]  ;;  %v3384_v22 = vor.u32 %v3749_v13, %v3383_v8  ;;  %v2729_v13 = vld [vmem:[%s5549_s1 + $0xd8] sm:$0xf0] }
  0x77   : > { %1718 = vmatpush.bf16.msrb.mxu0 %v3380_v26  ;;  %1707 = vmatmul.bf16.vlgmr.msra.gmra.mxu3 %v4481_v43  ;;  %v3673_v26 = vld [vmem:[%s5549_s1 + $0x394] sm:$0xf0]  ;;  %v2983_v17 = vld [vmem:[%s5549_s1 + $0x2c8] sm:$0xf] }
  0x78   : > { %1775 = vmatpush.bf16.msrb.mxu3 %v2872_v27  ;;  %1669 = vmatmul.bf16.vlgmr.msra.gmra.mxu1 %v4265_v51  ;;  %v2808_v27 = vor.u32 %v3605_v16, %v2807_v15  ;;  %v3080_v38 = vor.u32 %v3673_v26, %v3079_v25  ;;  %v3709_v15 = vld [vmem:[%s5549_s1 + $0x4b4] sm:$0xf0]  ;;  %v3048_v16 = vor.u32 %v3665_v11, %v3047_v10  ;;  %v3191_v40 = vld [vmem:[%s5549_s1 + $0x468] sm:$0xf]  ;;  %v3583_v10 = vld [vmem:[%s5549_s1 + $0xcc] sm:$0xf] }
  0x79   : > { %1813 = vmatpush.bf16.msra.mxu1 %v3128_v0  ;;  %1762 = vmatpush.bf16.msrb.mxu2 %v2648_v30  ;;  %v3669_v0 = vld [vmem:[%s5549_s1 + $0x374] sm:$0xf0]  ;;  %v2984_v25 = vor.u32 %v3649_v18, %v2983_v17  ;;  %v2967_v30 = vld [vmem:[%s5549_s1 + $0x2a8] sm:$0xf] }
  0x7a   : > { %v3064_v3 = vor.u32 %v3669_v0, %v3063_v63  ;;  %v3661_v21 = vld [vmem:[%s5549_s1 + $0x334] sm:$0xf0]  ;;  %v2951_v53 = vld [vmem:[%s5549_s1 + $0x288] sm:$0xf] }
  0x7b   : > { %1719 = vmatpush.bf16.msrb.mxu0 %v3364_v34  ;;  %v2631_v34 = vld [vmem:[%s5549_s1 + $0x8] sm:$0xf]  ;;  %v3745_v26 = vld [vmem:[%s5549_s1 + $0x5d4] sm:$0xf0] }
  0x7c   : > { %1776 = vmatpush.bf16.msrb.mxu3 %v2856_v46  ;;  %v2792_v46 = vor.u32 %v3601_v29, %v2791_v28  ;;  %v2632_v54 = vor.u32 %v3561_v35, %v2631_v34  ;;  %v3705_v28 = vld [vmem:[%s5549_s1 + $0x494] sm:$0xf0]  ;;  %v3351_v34 = vld [vmem:[%s5549_s1 + $0x5a8] sm:$0xf] }
  0x7d   : > { %1814 = vmatpush.bf16.msra.mxu1 %v3112_v12  ;;  %v3741_v35 = vld [vmem:[%s5549_s1 + $0x5b4] sm:$0xf0]  ;;  %v3335_v59 = vld [vmem:[%s5549_s1 + $0x588] sm:$0xf] }
  0x7e   : > { %1763 = vmatpush.bf16.msrb.mxu2 %v2632_v54  ;;  %v3701_v42 = vld [vmem:[%s5549_s1 + $0x474] sm:$0xf0]  ;;  %v3352_v58 = vor.u32 %v3741_v35, %v3351_v34  ;;  %v3175_v63 = vld [vmem:[%s5549_s1 + $0x448] sm:$0xf]  ;;  %v3619_v34 = vld [vmem:[%s5549_s1 + $0x1ec] sm:$0xf] }
  0x7f   : > { %1720 = vmatpush.bf16.msrb.mxu0 %v3348_v57  ;;  %v3284_v57 = vor.u32 %v3722_v33, %v3281_v39  ;;  %v3015_v39 = vld [vmem:[%s5549_s1 + $0x308] sm:$0xf]  ;;  %v3641_v54 = vld [vmem:[%s5549_s1 + $0x294] sm:$0xf0]  ;;  %v3192_v61 = vor.u32 %v3701_v42, %v3191_v40  ;;  %v2873_v35 = vld [vmem:[%s5549_s1 + $0x1f8] sm:$0xf0] }
  0x80   : > { %1777 = vmatpush.bf16.msrb.mxu3 %v2840_v1  ;;  %v2999_v1 = vld [vmem:[%s5549_s1 + $0x2e8] sm:$0xf]  ;;  %v3697_v0 = vld [vmem:[%s5549_s1 + $0x454] sm:$0xf0]  ;;  %v2697_v40 = vld [vmem:[%s5549_s1 + $0x98] sm:$0xf0] }
  0x81   : > { %1815 = vmatpush.bf16.msra.mxu1 %v3096_v23  ;;  %v3000_v12 = vor.u32 %v3653_v2, %v2999_v1  ;;  %v3367_v23 = vld [vmem:[%s5549_s1 + $0x5c8] sm:$0xf]  ;;  %v2745_v1 = vld [vmem:[%s5549_s1 + $0xf8] sm:$0xf0]  ;;  %v3733_v8 = vld [vmem:[%s5549_s1 + $0x574] sm:$0xf0] }
  0x82   : > { %1832 = vmatpush.bf16.msra.mxu2 %v3256_v60  ;;  %v3368_v33 = vor.u32 %v3745_v26, %v3367_v23  ;;  %v3737_v60 = vld [vmem:[%s5549_s1 + $0x594] sm:$0xf0]  ;;  %v2748_v2 = vor.u32 %v3587_v62, %v2745_v1  ;;  %v3159_v11 = vld [vmem:[%s5549_s1 + $0x428] sm:$0xf]  ;;  %v3651_v62 = vld [vmem:[%s5549_s1 + $0x2ec] sm:$0xf] }
  0x83   : > { %1721 = vmatpush.bf16.msrb.mxu0 %v3332_v6  ;;  %v3593_v6 = vld [vmem:[%s5549_s1 + $0x114] sm:$0xf0]  ;;  %v3143_v23 = vld [vmem:[%s5549_s1 + $0x408] sm:$0xf]  ;;  %v3001_v1 = vld [vmem:[%s5549_s1 + $0x2f8] sm:$0xf0] }
  0x84   : > { %1778 = vmatpush.bf16.msrb.mxu3 %v2824_v14  ;;  %v3223_v14 = vld [vmem:[%s5549_s1 + $0x4a8] sm:$0xf]  ;;  %v2760_v20 = vor.u32 %v3593_v6, %v2759_v5  ;;  %v3637_v5 = vld [vmem:[%s5549_s1 + $0x274] sm:$0xf0]  ;;  %v3336_v6 = vor.u32 %v3737_v60, %v3335_v59  ;;  %v3615_v59 = vld [vmem:[%s5549_s1 + $0x1cc] sm:$0xf] }
  0x85   : > { %1816 = vmatpush.bf16.msra.mxu1 %v3080_v38  ;;  %v3224_v24 = vor.u32 %v3709_v15, %v3223_v14  ;;  %v2732_v14 = vor.u32 %v3583_v10, %v2729_v13  ;;  %v3633_v17 = vld [vmem:[%s5549_s1 + $0x254] sm:$0xf0]  ;;  %v2857_v60 = vld [vmem:[%s5549_s1 + $0x1d8] sm:$0xf0]  ;;  %v3004_v10 = vor.u32 %v3651_v62, %v3001_v1 }
  0x86   : > { %1655 = vmatmul.bf16.gmra.mxu0 %v4357_v36  ;;  %1693 = vmatmul.bf16.gmra.mxu2 %v4370_v41  ;;  %v2985_v13 = vld [vmem:[%s5549_s1 + $0x2d8] sm:$0xf0] }
  0x87   : > { %1722 = vmatpush.bf16.msrb.mxu0 %v3316_v19  ;;  %1712 = vmatmul.bf16.gmra.mxu3 %v4594_v47  ;;  %v3031_v19 = vld [vmem:[%s5549_s1 + $0x328] sm:$0xf] }
  0x88   : > { %1779 = vmatpush.bf16.msrb.mxu3 %v2808_v27  ;;  %1674 = vmatmul.bf16.gmra.mxu1 %v4359_v37  ;;  %v3207_v27 = vld [vmem:[%s5549_s1 + $0x488] sm:$0xf]  ;;  %v3032_v29 = vor.u32 %v3661_v21, %v3031_v19 }
  0x89   : > { %1817 = vmatpush.bf16.msra.mxu1 %v3064_v3  ;;  %1833 = vmatpush.bf16.msra.mxu2 %v3240_v9  ;;  %v3208_v38 = vor.u32 %v3705_v28, %v3207_v27  ;;  %v2952_v3 = vor.u32 %v3641_v54, %v2951_v53  ;;  %v3176_v9 = vor.u32 %v3697_v0, %v3175_v63  ;;  %v3303_v19 = vld [vmem:[%s5549_s1 + $0x548] sm:$0xf]  ;;  %v3753_v0 = vld [vmem:[%s5549_s1 + $0x614] sm:$0xf0] }
  0x8a   : > { %v2903_v28 = vld [vmem:[%s5549_s1 + $0x228] sm:$0xf]  ;;  %v2876_v54 = vor.u32 %v3619_v34, %v2873_v35  ;;  %v3639_v35 = vld [vmem:[%s5549_s1 + $0x28c] sm:$0xf] }
  0x8b   : > { %1723 = vmatpush.bf16.msrb.mxu0 %v3300_v32  ;;  %v3645_v32 = vld [vmem:[%s5549_s1 + $0x2b4] sm:$0xf0]  ;;  %v3271_v53 = vld [vmem:[%s5549_s1 + $0x508] sm:$0xf] }
  0x8c   : > { %1780 = vmatpush.bf16.msrb.mxu3 %v2792_v46  ;;  %v3657_v46 = vld [vmem:[%s5549_s1 + $0x314] sm:$0xf0]  ;;  %v2968_v52 = vor.u32 %v3645_v32, %v2967_v30  ;;  %v3287_v32 = vld [vmem:[%s5549_s1 + $0x528] sm:$0xf] }
  0x8d   : > { %1818 = vmatpush.bf16.msra.mxu1 %v3048_v16  ;;  %1834 = vmatpush.bf16.msra.mxu2 %v3224_v24  ;;  %v2919_v16 = vld [vmem:[%s5549_s1 + $0x248] sm:$0xf]  ;;  %v3689_v24 = vld [vmem:[%s5549_s1 + $0x414] sm:$0xf0] }
  0x8e   : > { %v2920_v27 = vor.u32 %v3633_v17, %v2919_v16  ;;  %v3399_v63 = vld [vmem:[%s5549_s1 + $0x608] sm:$0xf]  ;;  %v5079_v16 = vld [vmem:[%s5550_s2] sm:$0xf] }
  0x8f   : > { %1724 = vmatpush.bf16.msrb.mxu0 %v3284_v57  ;;  %v3016_v57 = vor.u32 %v3657_v46, %v3015_v39  ;;  %v3575_v39 = vld [vmem:[%s5549_s1 + $0x8c] sm:$0xf]  ;;  %v2887_v46 = vld [vmem:[%s5549_s1 + $0x208] sm:$0xf] }
  0x90   : > { %1781 = vmatpush.bf16.msrb.mxu3 %v2776_v4  ;;  %v2935_v4 = vld [vmem:[%s5549_s1 + $0x268] sm:$0xf] }
  0x91   : > { %1819 = vmatpush.bf16.msra.mxu1 %v3032_v29  ;;  %1835 = vmatpush.bf16.msra.mxu2 %v3208_v38  ;;  %v2936_v15 = vor.u32 %v3637_v5, %v2935_v4  ;;  %v3629_v29 = vld [vmem:[%s5549_s1 + $0x234] sm:$0xf0]  ;;  %v2860_v5 = vor.u32 %v3615_v59, %v2857_v60  ;;  %v3715_v60 = vld [vmem:[%s5549_s1 + $0x4ec] sm:$0xf] }
  0x92   : > { %v3725_v38 = vld [vmem:[%s5549_s1 + $0x534] sm:$0xf0]  ;;  %v2904_v42 = vor.u32 %v3629_v29, %v2903_v28  ;;  %v3563_v29 = vld [vmem:[%s5549_s1 + $0x2c] sm:$0xf] }
  0x93   : > { %1725 = vmatpush.bf16.msrb.mxu0 %v3268_v7  ;;  %v3319_v7 = vld [vmem:[%s5549_s1 + $0x568] sm:$0xf] }
  0x94   : > { %1782 = vmatpush.bf16.msrb.mxu3 %v2760_v20  ;;  %v3320_v18 = vor.u32 %v3733_v8, %v3319_v7  ;;  %v3729_v20 = vld [vmem:[%s5549_s1 + $0x554] sm:$0xf0]  ;;  %v3400_v7 = vor.u32 %v3753_v0, %v3399_v63  ;;  %v3611_v8 = vld [vmem:[%s5549_s1 + $0x1ac] sm:$0xf]  ;;  %v2937_v0 = vld [vmem:[%s5549_s1 + $0x278] sm:$0xf0] }
  0x95   : > { %1820 = vmatpush.bf16.msra.mxu1 %v3016_v57  ;;  %1836 = vmatpush.bf16.msra.mxu2 %v3192_v61  ;;  %v3304_v30 = vor.u32 %v3729_v20, %v3303_v19  ;;  %v3288_v57 = vor.u32 %v3725_v38, %v3287_v32  ;;  %v2700_v61 = vor.u32 %v3575_v39, %v2697_v40  ;;  %v2825_v19 = vld [vmem:[%s5549_s1 + $0x198] sm:$0xf0]  ;;  %v3635_v63 = vld [vmem:[%s5549_s1 + $0x26c] sm:$0xf] }
  0x96   : > { %1726 = vmatmul.bf16.vlgmr.msrb.gmra.mxu0 %v4483_v44  ;;  %1764 = vmatmul.bf16.vlgmr.msrb.gmra.mxu2 %v4258_v45  ;;  %v2953_v38 = vld [vmem:[%s5549_s1 + $0x298] sm:$0xf0] }
  0x97   : > { %1794 = vmatpush.bf16.msra.mxu0 %v3000_v12  ;;  %1783 = vmatmul.bf16.vlgmr.msrb.gmra.mxu3 %v4263_v50  ;;  %v3693_v12 = vld [vmem:[%s5549_s1 + $0x434] sm:$0xf0]  ;;  %v2956_v62 = vor.u32 %v3639_v35, %v2953_v38  ;;  %v3627_v35 = vld [vmem:[%s5549_s1 + $0x22c] sm:$0xf]  ;;  %v2905_v38 = vld [vmem:[%s5549_s1 + $0x238] sm:$0xf0] }
  0x98   : > { %1851 = vmatpush.bf16.msra.mxu3 %v3384_v22  ;;  %3407 = vmatmul.msk.bf16.vlgmr.msrb.gmra.mxu1 %vm1483_vm0, %v4494_v49  ;;  %v3160_v21 = vor.u32 %v3693_v12, %v3159_v11  ;;  %v3579_v22 = vld [vmem:[%s5549_s1 + $0xac] sm:$0xf] }
  0x99   : > { %1889 = vmatpush.bf16.msrb.mxu1 %v2748_v2  ;;  %1837 = vmatpush.bf16.msra.mxu2 %v3176_v9  ;;  %v3571_v2 = vld [vmem:[%s5549_s1 + $0x6c] sm:$0xf]  ;;  %v2841_v9 = vld [vmem:[%s5549_s1 + $0x1b8] sm:$0xf0] }
  0x9a   : > { %v3647_v11 = vld [vmem:[%s5549_s1 + $0x2cc] sm:$0xf]  ;;  %v2844_v17 = vor.u32 %v3611_v8, %v2841_v9 }
  0x9b   : > { %1795 = vmatpush.bf16.msra.mxu0 %v2984_v25  ;;  %v2713_v25 = vld [vmem:[%s5549_s1 + $0xb8] sm:$0xf0]  ;;  %v2988_v20 = vor.u32 %v3647_v11, %v2985_v13 }
  0x9c   : > { %1852 = vmatpush.bf16.msra.mxu3 %v3368_v33  ;;  %v2716_v26 = vor.u32 %v3579_v22, %v2713_v25  ;;  %v3144_v33 = vor.u32 %v3689_v24, %v3143_v23  ;;  %v5088_v22 = vperm.slane %v5079_v16, 0  ;;  %v3643_v23 = vld [vmem:[%s5549_s1 + $0x2ac] sm:$0xf]  ;;  %v2969_v25 = vld [vmem:[%s5549_s1 + $0x2b8] sm:$0xf0] }
  0x9d   : > { %1890 = vmatpush.bf16.msrb.mxu1 %v2732_v14  ;;  %1838 = vmatpush.bf16.msra.mxu2 %v3160_v21  ;;  %v3567_v14 = vld [vmem:[%s5549_s1 + $0x4c] sm:$0xf]  ;;  %v2972_v34 = vor.u32 %v3643_v23, %v2969_v25  ;;  %v3113_v11 = vld [vmem:[%s5549_s1 + $0x3d8] sm:$0xf0] }
  0x9e   : > { %v3591_v25 = vld [vmem:[%s5549_s1 + $0x10c] sm:$0xf] }
  0x9f   : > { %1796 = vmatpush.bf16.msra.mxu0 %v2968_v52  ;;  %v3625_v52 = vld [vmem:[%s5549_s1 + $0x214] sm:$0xf0] }
  0xa0   : > { %1853 = vmatpush.bf16.msra.mxu3 %v3352_v58  ;;  %v3721_v58 = vld [vmem:[%s5549_s1 + $0x514] sm:$0xf0]  ;;  %v2888_v4 = vor.u32 %v3625_v52, %v2887_v46  ;;  %v2793_v46 = vld [vmem:[%s5549_s1 + $0x158] sm:$0xf0] }
  0xa1   : > { %1891 = vmatpush.bf16.msrb.mxu1 %v2716_v26  ;;  %1839 = vmatpush.bf16.msra.mxu2 %v3144_v33  ;;  %v3603_v26 = vld [vmem:[%s5549_s1 + $0x16c] sm:$0xf] }
  0xa3   : > { %1797 = vmatpush.bf16.msra.mxu0 %v2952_v3  ;;  %v2681_v3 = vld [vmem:[%s5549_s1 + $0x78] sm:$0xf0] }
  0xa4   : > { %1854 = vmatpush.bf16.msra.mxu3 %v3336_v6  ;;  %v3272_v6 = vor.u32 %v3721_v58, %v3271_v53  ;;  %v2684_v12 = vor.u32 %v3571_v2, %v2681_v3  ;;  %v3683_v53 = vld [vmem:[%s5549_s1 + $0x3ec] sm:$0xf]  ;;  %v3129_v58 = vld [vmem:[%s5549_s1 + $0x3f8] sm:$0xf0] }
  0xa5   : > { %1908 = vmatpush.bf16.msrb.mxu2 %v2876_v54  ;;  %1892 = vmatpush.bf16.msrb.mxu1 %v2700_v61  ;;  %v3559_v54 = vld [vmem:[%s5549_s1 + $0xc] sm:$0xf]  ;;  %v3132_v59 = vor.u32 %v3683_v53, %v3129_v58  ;;  %v3257_v61 = vld [vmem:[%s5549_s1 + $0x4f8] sm:$0xf0] }
  0xa6   : > { %1731 = vmatmul.bf16.gmra.mxu0 %v4596_v48  ;;  %1769 = vmatmul.bf16.gmra.mxu2 %v4346_v31  ;;  %v3595_v3 = vld [vmem:[%s5549_s1 + $0x12c] sm:$0xf] }
  0xa7   : > { %1798 = vmatpush.bf16.msra.mxu0 %v2936_v15  ;;  %1788 = vmatmul.bf16.gmra.mxu3 %v4357_v36  ;;  %v2665_v15 = vld [vmem:[%s5549_s1 + $0x58] sm:$0xf0]  ;;  %v3671_v53 = vld [vmem:[%s5549_s1 + $0x38c] sm:$0xf] }
  0xa8   : > { %1855 = vmatpush.bf16.msra.mxu3 %v3320_v18  ;;  %3408 = vmatmul.msk.bf16.gmra.mxu1 %vm1483_vm0, %v4607_v56  ;;  %v3607_v18 = vld [vmem:[%s5549_s1 + $0x18c] sm:$0xf]  ;;  %v2668_v21 = vor.u32 %v3567_v14, %v2665_v15 }
  0xa9   : > { %1909 = vmatpush.bf16.msrb.mxu2 %v2860_v5  ;;  %1893 = vmatpush.bf16.msrb.mxu1 %v2684_v12  ;;  %v2828_v24 = vor.u32 %v3607_v18, %v2825_v19  ;;  %v3711_v15 = vld [vmem:[%s5549_s1 + $0x4cc] sm:$0xf]  ;;  %v2940_v19 = vor.u32 %v3635_v63, %v2937_v0 }
  0xaa   : > { %v3623_v0 = vld [vmem:[%s5549_s1 + $0x20c] sm:$0xf] }
  0xab   : > { %1799 = vmatpush.bf16.msra.mxu0 %v2920_v27  ;;  %v2809_v27 = vld [vmem:[%s5549_s1 + $0x178] sm:$0xf0] }
  0xac   : > { %1856 = vmatpush.bf16.msra.mxu3 %v3304_v30  ;;  %v2649_v30 = vld [vmem:[%s5549_s1 + $0x38] sm:$0xf0]  ;;  %v2812_v39 = vor.u32 %v3603_v26, %v2809_v27  ;;  %v3675_v27 = vld [vmem:[%s5549_s1 + $0x3ac] sm:$0xf] }
  0xad   : > { %1910 = vmatpush.bf16.msrb.mxu2 %v2844_v17  ;;  %1894 = vmatpush.bf16.msrb.mxu1 %v2668_v21  ;;  %v2652_v52 = vor.u32 %v3563_v29, %v2649_v30  ;;  %v3241_v17 = vld [vmem:[%s5549_s1 + $0x4d8] sm:$0xf0] }
  0xae   : > { %v2921_v21 = vld [vmem:[%s5549_s1 + $0x258] sm:$0xf0]  ;;  %v3244_v30 = vor.u32 %v3711_v15, %v3241_v17 }
  0xaf   : > { %1800 = vmatpush.bf16.msra.mxu0 %v2904_v42  ;;  %v3599_v42 = vld [vmem:[%s5549_s1 + $0x14c] sm:$0xf]  ;;  %v2761_v26 = vld [vmem:[%s5549_s1 + $0x118] sm:$0xf0] }
  0xb0   : > { %1857 = vmatpush.bf16.msra.mxu3 %v3288_v57  ;;  %v2633_v57 = vld [vmem:[%s5549_s1 + $0x18] sm:$0xf0]  ;;  %v2796_v1 = vor.u32 %v3599_v42, %v2793_v46  ;;  %v3707_v46 = vld [vmem:[%s5549_s1 + $0x4ac] sm:$0xf] }
  0xb1   : > { %1911 = vmatpush.bf16.msrb.mxu2 %v2828_v24  ;;  %1895 = vmatpush.bf16.msrb.mxu1 %v2652_v52  ;;  %v2636_v5 = vor.u32 %v3559_v54, %v2633_v57  ;;  %v3385_v29 = vld [vmem:[%s5549_s1 + $0x5f8] sm:$0xf0] }
  0xb2   : > { %v3225_v52 = vld [vmem:[%s5549_s1 + $0x4b8] sm:$0xf0] }
  0xb3   : > { %1801 = vmatpush.bf16.msra.mxu0 %v2888_v4  ;;  %v1499_v28 = vpop.f32.mrf.mxu0  ;;  %v2777_v4 = vld [vmem:[%s5549_s1 + $0x138] sm:$0xf0] }
  0xb4   : > { %1858 = vmatpush.bf16.msra.mxu3 %v3272_v6  ;;  %v1500_v32 = vadd.f32 %v1499_v28, %v5088_v22  ;;  %v3679_v6 = vld [vmem:[%s5549_s1 + $0x3cc] sm:$0xf]  ;;  %v2780_v23 = vor.u32 %v3595_v3, %v2777_v4  ;;  %v2908_v3 = vor.u32 %v3627_v35, %v2905_v38  ;;  %v2889_v4 = vld [vmem:[%s5549_s1 + $0x218] sm:$0xf0] }
  0xb5   : > { %v1518_v33 = vpop.f32.mrf.mxu1  ;;  %1912 = vmatpush.bf16.msrb.mxu2 %v2812_v39  ;;  %v3116_v14 = vor.u32 %v3679_v6, %v3113_v11  ;;  %1896 = vmatpush.bf16.msrb.mxu1 %v2636_v5  ;;  %v3747_v28 = vld [vmem:[%s5549_s1 + $0x5ec] sm:$0xf]  ;;  %v2764_v39 = vor.u32 %v3591_v25, %v2761_v26  ;;  %v3401_v6 = vld [vmem:[%s5549_s1 + $0x618] sm:$0xf0] }
  0xb6   : > { %v1519_v40 = vadd.f32 %v1518_v33, %v1500_v32  ;;  %1802 = vmatmul.bf16.vlgmr.msra.gmra.mxu0 %v4265_v51  ;;  %1840 = vmatmul.bf16.vlgmr.msra.gmra.mxu2 %v4481_v43  ;;  %v3097_v32 = vld [vmem:[%s5549_s1 + $0x3b8] sm:$0xf0]  ;;  %v3388_v42 = vor.u32 %v3747_v28, %v3385_v29  ;;  %v3751_v5 = vld [vmem:[%s5549_s1 + $0x60c] sm:$0xf] }
  0xb7   : > { %1877 = vmatpush.bf16.msrb.mxu0 %v3400_v7  ;;  %1859 = vmatmul.bf16.vlgmr.msra.gmra.mxu3 %v4483_v44  ;;  %v3100_v33 = vor.u32 %v3675_v27, %v3097_v32  ;;  %v3209_v11 = vld [vmem:[%s5549_s1 + $0x498] sm:$0xf0]  ;;  %v3699_v25 = vld [vmem:[%s5549_s1 + $0x46c] sm:$0xf] }
  0xb8   : > { %1927 = vmatpush.bf16.msrb.mxu3 %v3004_v10  ;;  %1821 = vmatmul.bf16.vlgmr.msra.gmra.mxu1 %v4272_v55  ;;  %v3260_v10 = vor.u32 %v3715_v60, %v3257_v61  ;;  %v3369_v60 = vld [vmem:[%s5549_s1 + $0x5d8] sm:$0xf0]  ;;  %v3663_v27 = vld [vmem:[%s5549_s1 + $0x34c] sm:$0xf] }
  0xb9   : > { %v1537_v2 = vpop.f32.mrf.mxu2  ;;  %1913 = vmatpush.bf16.msrb.mxu2 %v2796_v1  ;;  %v3081_v61 = vld [vmem:[%s5549_s1 + $0x398] sm:$0xf0]  ;;  %v3735_v32 = vld [vmem:[%s5549_s1 + $0x58c] sm:$0xf] }
  0xba   : > { %v1538_v7 = vadd.f32 %v1537_v2, %v1519_v40  ;;  %v1556_v8 = vpop.f32.mrf.mxu3  ;;  %1965 = vmatpush.bf16.msra.mxu1 %v3260_v10  ;;  %v3084_v1 = vor.u32 %v3671_v53, %v3081_v61  ;;  %v3703_v10 = vld [vmem:[%s5549_s1 + $0x48c] sm:$0xf]  ;;  %v3065_v15 = vld [vmem:[%s5549_s1 + $0x378] sm:$0xf0] }
  0xbb   : > { %1946 = vmatpush.bf16.msra.mxu0 %v3132_v59  ;;  %v1501_v9 = vpop.f32.mrf.mxu0  ;;  %v3743_v59 = vld [vmem:[%s5549_s1 + $0x5cc] sm:$0xf]  ;;  %v3193_v26 = vld [vmem:[%s5549_s1 + $0x478] sm:$0xf0] }
  0xbc   : > { %1928 = vmatpush.bf16.msrb.mxu3 %v2988_v20  ;;  %v1502_v12 = vadd.f32 %v1501_v9, %v5088_v22  ;;  %v5168_v18 = vadd.f32 %v1556_v8, %v1538_v7  ;;  %v3631_v20 = vld [vmem:[%s5549_s1 + $0x24c] sm:$0xf]  ;;  %v3228_v7 = vor.u32 %v3707_v46, %v3225_v52  ;;  %v3372_v9 = vor.u32 %v3743_v59, %v3369_v60  ;;  %v3033_v59 = vld [vmem:[%s5549_s1 + $0x338] sm:$0xf0] }
  0xbd   : > { %v1520_v13 = vpop.f32.mrf.mxu1  ;;  %1914 = vmatpush.bf16.msrb.mxu2 %v2780_v23  ;;  %v3404_v23 = vor.u32 %v3751_v5, %v3401_v6  ;;  %v3695_v53 = vld [vmem:[%s5549_s1 + $0x44c] sm:$0xf] }
  0xbe   : > { %v1521_v24 = vadd.f32 %v1520_v13, %v1502_v12  ;;  %1966 = vmatpush.bf16.msra.mxu1 %v3244_v30  ;;  %v3667_v12 = vld [vmem:[%s5549_s1 + $0x36c] sm:$0xf] }
  0xbf   : > { %1947 = vmatpush.bf16.msra.mxu0 %v3116_v14  ;;  %v3739_v13 = vld [vmem:[%s5549_s1 + $0x5ac] sm:$0xf]  ;;  %v3353_v14 = vld [vmem:[%s5549_s1 + $0x5b8] sm:$0xf0]  ;;  %v3068_v17 = vor.u32 %v3667_v12, %v3065_v15 }
  0xc0   : > { %1929 = vmatpush.bf16.msrb.mxu3 %v2972_v34  ;;  %v2924_v34 = vor.u32 %v3631_v20, %v2921_v21  ;;  %v3212_v20 = vor.u32 %v3703_v10, %v3209_v11  ;;  %v3727_v6 = vld [vmem:[%s5549_s1 + $0x54c] sm:$0xf] }
  0xc1   : > { %v1539_v40 = vpop.f32.mrf.mxu2  ;;  %1915 = vmatpush.bf16.msrb.mxu2 %v2764_v39  ;;  %v3687_v15 = vld [vmem:[%s5549_s1 + $0x40c] sm:$0xf] }
  0xc2   : > { %v1540_v54 = vadd.f32 %v1539_v40, %v1521_v24  ;;  %v1558_v57 = vpop.f32.mrf.mxu3  ;;  %1967 = vmatpush.bf16.msra.mxu1 %v3228_v7  ;;  %v3356_v24 = vor.u32 %v3739_v13, %v3353_v14  ;;  %v3305_v7 = vld [vmem:[%s5549_s1 + $0x558] sm:$0xf0] }
  0xc3   : > { %1948 = vmatpush.bf16.msra.mxu0 %v3100_v33  ;;  %v1504_v58 = vpop.f32.mrf.mxu0  ;;  %v3337_v33 = vld [vmem:[%s5549_s1 + $0x598] sm:$0xf0]  ;;  %v3308_v14 = vor.u32 %v3727_v6, %v3305_v7 }
  0xc4   : > { %1930 = vmatpush.bf16.msrb.mxu3 %v2956_v62  ;;  %v1505_v62 = vadd.f32 %v1504_v58, %v5088_v22  ;;  %v5222_v2 = vadd.f32 %v1558_v57, %v1540_v54  ;;  %v3340_v52 = vor.u32 %v3735_v32, %v3337_v33  ;;  %v3177_v54 = vld [vmem:[%s5549_s1 + $0x458] sm:$0xf0]  ;;  %v3731_v57 = vld [vmem:[%s5549_s1 + $0x56c] sm:$0xf] }
  0xc5   : > { %v1523_v63 = vpop.f32.mrf.mxu1  ;;  %1984 = vmatpush.bf16.msra.mxu2 %v3388_v42  ;;  %v3196_v42 = vor.u32 %v3699_v25, %v3193_v26  ;;  %v3321_v58 = vld [vmem:[%s5549_s1 + $0x578] sm:$0xf0]  ;;  %v3180_v61 = vor.u32 %v3695_v53, %v3177_v54  ;;  %v3719_v26 = vld [vmem:[%s5549_s1 + $0x50c] sm:$0xf] }
  0xc6   : > { %v1524_v8 = vadd.f32 %v1523_v63, %v1505_v62  ;;  %1807 = vmatmul.bf16.gmra.mxu0 %v4359_v37  ;;  %1845 = vmatmul.bf16.gmra.mxu2 %v4594_v47  ;;  %v3324_v63 = vor.u32 %v3731_v57, %v3321_v58  ;;  %v3759_v33 = vld [vmem:[%s5551_s3 + $0x28] sm:$0xff]  ;;  %v3769_v53 = vld [vmem:[%s5551_s3 + $0x78] sm:$0xff] }
  0xc7   : > { %1949 = vmatpush.bf16.msra.mxu0 %v3084_v1  ;;  %1864 = vmatmul.bf16.gmra.mxu3 %v4596_v48  ;;  %v3161_v1 = vld [vmem:[%s5549_s1 + $0x438] sm:$0xf0] }
  0xc8   : > { %1931 = vmatpush.bf16.msrb.mxu3 %v2940_v19  ;;  %1826 = vmatmul.bf16.gmra.mxu1 %v4370_v41  ;;  %v2892_v19 = vor.u32 %v3623_v0, %v2889_v4  ;;  %v3691_v0 = vld [vmem:[%s5549_s1 + $0x42c] sm:$0xf]  ;;  %v3757_v57 = vld [vmem:[%s5551_s3 + $0x18] sm:$0xff] }
  0xc9   : > { %v1542_v21 = vpop.f32.mrf.mxu2  ;;  %1985 = vmatpush.bf16.msra.mxu2 %v3372_v9  ;;  %1968 = vmatpush.bf16.msra.mxu1 %v3212_v20  ;;  %v3164_v12 = vor.u32 %v3691_v0, %v3161_v1  ;;  %v3289_v20 = vld [vmem:[%s5549_s1 + $0x538] sm:$0xf0]  ;;  %v3755_v1 = vld [vmem:[%s5551_s3 + $0x8] sm:$0xff] }
  0xca   : > { %v1543_v28 = vadd.f32 %v1542_v21, %v1524_v8  ;;  %v1561_v29 = vpop.f32.mrf.mxu3  ;;  %v3017_v8 = vld [vmem:[%s5549_s1 + $0x318] sm:$0xf0] }
  0xcb   : > { %1950 = vmatpush.bf16.msra.mxu0 %v3068_v17  ;;  %v1506_v30 = vpop.f32.mrf.mxu0  ;;  %v3145_v17 = vld [vmem:[%s5549_s1 + $0x418] sm:$0xf0] }
  0xcc   : > { %1932 = vmatpush.bf16.msrb.mxu3 %v2924_v34  ;;  %v3049_v34 = vld [vmem:[%s5549_s1 + $0x358] sm:$0xf0]  ;;  %v1507_v35 = vadd.f32 %v1506_v30, %v5088_v22  ;;  %v5274_v40 = vadd.f32 %v1561_v29, %v1543_v28  ;;  %v3659_v22 = vld [vmem:[%s5549_s1 + $0x32c] sm:$0xf] }
  0xcd   : > { %v1525_v38 = vpop.f32.mrf.mxu1  ;;  %v3052_v39 = vor.u32 %v3663_v27, %v3049_v34  ;;  %1986 = vmatpush.bf16.msra.mxu2 %v3356_v24  ;;  %v3036_v60 = vor.u32 %v3659_v22, %v3033_v59  ;;  %1969 = vmatpush.bf16.msra.mxu1 %v3196_v42  ;;  %v3761_v21 = vld [vmem:[%s5551_s3 + $0x38] sm:$0xff]  ;;  %v3768_v59 = vld [vmem:[%s5551_s3 + $0x70] sm:$0xff] }
  0xce   : > { %v1526_v46 = vadd.f32 %v1525_v38, %v1507_v35  ;;  %v3273_v27 = vld [vmem:[%s5549_s1 + $0x518] sm:$0xf0] }
  0xcf   : > { %1951 = vmatpush.bf16.msra.mxu0 %v3052_v39  ;;  %v3276_v32 = vor.u32 %v3719_v26, %v3273_v27  ;;  %v496_v26 = vperm.slane %v5079_v16, 1 }
  0xd0   : > { %1933 = vmatpush.bf16.msrb.mxu3 %v2908_v3  ;;  %v3655_v3 = vld [vmem:[%s5549_s1 + $0x30c] sm:$0xf] }
  0xd1   : > { %v1544_v62 = vpop.f32.mrf.mxu2  ;;  %1987 = vmatpush.bf16.msra.mxu2 %v3340_v52  ;;  %1970 = vmatpush.bf16.msra.mxu1 %v3180_v61  ;;  %v3020_v13 = vor.u32 %v3655_v3, %v3017_v8  ;;  %v3754_v8 = vld [vmem:[%s5551_s3] sm:$0xff] }
  0xd2   : > { %v1545_v4 = vadd.f32 %v1544_v62, %v1526_v46  ;;  %v1563_v5 = vpop.f32.mrf.mxu3 }
  0xd3   : > { %1952 = vmatpush.bf16.msra.mxu0 %v3036_v60  ;;  %v1575_v9 = vpop.f32.mrf.mxu0 }
  0xd4   : > { %1934 = vmatpush.bf16.msrb.mxu3 %v2892_v19  ;;  %v5312_v11 = vadd.f32 %v1563_v5, %v1545_v4  ;;  %v3723_v19 = vld [vmem:[%s5549_s1 + $0x52c] sm:$0xf] }
  0xd5   : > { %v1594_v10 = vpop.f32.mrf.mxu1  ;;  %1988 = vmatpush.bf16.msra.mxu2 %v3324_v63  ;;  %1971 = vmatpush.bf16.msra.mxu1 %v3164_v12  ;;  %v3765_v12 = vld [vmem:[%s5551_s3 + $0x58] sm:$0xff] }
  0xd6   : > { %3409 = vmatmul.msk.bf16.vlgmr.msrb.gmra.mxu0 %vm1483_vm0, %v4494_v49  ;;  %1916 = vmatmul.bf16.vlgmr.msrb.gmra.mxu2 %v4263_v50  ;;  %v3760_v50 = vld [vmem:[%s5551_s3 + $0x30] sm:$0xff] }
  0xd7   : > { %1935 = vmatmul.bf16.vlgmr.msrb.gmra.mxu3 %v4265_v51  ;;  %1953 = vmatpush.bf16.msra.mxu0 %v3020_v13  ;;  %v1576_v51 = vadd.f32 %v1575_v9, %v5168_v18  ;;  %v3758_v18 = vld [vmem:[%s5551_s3 + $0x20] sm:$0xff] }
  0xd8   : > { %2010 = vmatpush.bf16.msra.mxu3 %v3404_v23  ;;  %1897 = vmatmul.bf16.vlgmr.msrb.gmra.mxu1 %v4258_v45  ;;  %v3148_v23 = vor.u32 %v3687_v15, %v3145_v17  ;;  %v3292_v45 = vor.u32 %v3723_v19, %v3289_v20  ;;  %v3764_v17 = vld [vmem:[%s5551_s3 + $0x50] sm:$0xff] }
  0xd9   : > { %1989 = vmatpush.bf16.msra.mxu2 %v3308_v14  ;;  %v1613_v24 = vpop.f32.mrf.mxu2  ;;  %v1595_v34 = vadd.f32 %v1594_v10, %v1576_v51 }
  0xda   : > { %v5334_v25 = vpop.f32.mrf.mxu3  ;;  %1972 = vmatpush.bf16.msra.mxu1 %v3148_v23 }
  0xdb   : > { %2306 = vmatpush.bf16.msrb.mxu0 %v3761_v21  ;;  %v1577_v28 = vpop.f32.mrf.mxu0  ;;  %v1614_v35 = vadd.f32 %v1613_v24, %v1595_v34  ;;  %v1633_v27 = vadd.f32 %v5334_v25, %v496_v26 }
  0xdc   : > { %v1578_v30 = vadd.f32 %v1577_v28, %v5222_v2 }
  0xdd   : > { %v1596_v29 = vpop.f32.mrf.mxu1  ;;  %1990 = vmatpush.bf16.msra.mxu2 %v3292_v45  ;;  %v2022_v54 = vmax.f32 %v1614_v35, 0.0 }
  0xde   : > { %v1597_v38 = vadd.f32 %v1596_v29, %v1578_v30  ;;  %2325 = vmatpush.bf16.msrb.mxu1 %v3769_v53 }
  0xdf   : > { %2307 = vmatpush.bf16.msrb.mxu0 %v3760_v50 }
  0xe1   : > { %1991 = vmatpush.bf16.msra.mxu2 %v3276_v32  ;;  %v1615_v39 = vpop.f32.mrf.mxu2 }
  0xe2   : > { %v5350_v42 = vpop.f32.mrf.mxu3  ;;  %v1616_v2 = vadd.f32 %v1615_v39, %v1597_v38  ;;  %2326 = vmatpush.bf16.msrb.mxu1 %v3768_v59 }
  0xe3   : > { %2308 = vmatpush.bf16.msrb.mxu0 %v3759_v33  ;;  %v1580_v46 = vpop.f32.mrf.mxu0  ;;  %v1635_v32 = vadd.f32 %v5350_v42, %v496_v26 }
  0xe4   : > { %v2026_v22 = vmax.f32 %v1616_v2, 0.0  ;;  %v1581_v62 = vadd.f32 %v1580_v46, %v5274_v40  ;;  %v3766_v40 = vld [vmem:[%s5551_s3 + $0x60] sm:$0xff] }
  0xe5   : > { %v1599_v52 = vpop.f32.mrf.mxu1 }
  0xe6   : > { %3410 = vmatmul.msk.bf16.gmra.mxu0 %vm1483_vm0, %v4607_v56  ;;  %v5364_v58 = vpack.c.bf16 %v2026_v22, %v2022_v54  ;;  %1921 = vmatmul.bf16.gmra.mxu2 %v4357_v36  ;;  %v3767_v36 = vld [vmem:[%s5551_s3 + $0x68] sm:$0xff]  ;;  %v1600_v3 = vadd.f32 %v1599_v52, %v1581_v62 }
  0xe7   : > { %2309 = vmatpush.bf16.msrb.mxu0 %v3758_v18  ;;  %1940 = vmatmul.bf16.gmra.mxu3 %v4359_v37 }
  0xe8   : > { %1902 = vmatmul.bf16.gmra.mxu1 %v4346_v31  ;;  %v3756_v31 = vld [vmem:[%s5551_s3 + $0x10] sm:$0xff] }
  0xe9   : > { %v1618_v60 = vpop.f32.mrf.mxu2  ;;  %2327 = vmatpush.bf16.msrb.mxu1 %v3767_v36 }
  0xea   : > { %v5371_v61 = vpop.f32.mrf.mxu3  ;;  %v1619_v4 = vadd.f32 %v1618_v60, %v1600_v3  ;;  %v3777_v3 = vld [vmem:[%s5551_s3 + $0xb8] sm:$0xff] }
  0xeb   : > { %2310 = vmatpush.bf16.msrb.mxu0 %v3757_v57  ;;  %v1582_v63 = vpop.f32.mrf.mxu0  ;;  %v1638_v25 = vadd.f32 %v5371_v61, %v496_v26  ;;  %2344 = vmatpush.bf16.msrb.mxu2 %v3777_v3 }
  0xec   : > { %v1583_v37 = vadd.f32 %v1582_v63, %v5312_v11  ;;  %v2030_v13 = vmax.f32 %v1619_v4, 0.0 }
  0xed   : > { %v1601_v0 = vpop.f32.mrf.mxu1  ;;  %2328 = vmatpush.bf16.msrb.mxu1 %v3766_v40 }
  0xee   : > { %v1602_v5 = vadd.f32 %v1601_v0, %v1583_v37 }
  0xef   : > { %2311 = vmatpush.bf16.msrb.mxu0 %v3756_v31 }
  0xf1   : > { %v1620_v6 = vpop.f32.mrf.mxu2  ;;  %2329 = vmatpush.bf16.msrb.mxu1 %v3765_v12 }
  0xf2   : > { %v5387_v7 = vpop.f32.mrf.mxu3  ;;  %v1621_v9 = vadd.f32 %v1620_v6, %v1602_v5 }
  0xf3   : > { %2312 = vmatpush.bf16.msrb.mxu0 %v3755_v1  ;;  %v1651_v10 = vpop.f32.mrf.mxu0  ;;  %v1640_v60 = vadd.f32 %v5387_v7, %v496_v26 }
  0xf4   : > { %v2034_v14 = vmax.f32 %v1621_v9, 0.0  ;;  %v1652_v30 = vadd.f32 %v1651_v10, %v1633_v27  ;;  %v3772_v27 = vld [vmem:[%s5551_s3 + $0x90] sm:$0xff] }
  0xf5   : > { %v1670_v11 = vpop.f32.mrf.mxu1  ;;  %2330 = vmatpush.bf16.msrb.mxu1 %v3764_v17 }
  0xf6   : > { %1954 = vmatmul.bf16.vlgmr.msra.gmra.mxu0 %v4272_v55  ;;  %1992 = vmatmul.bf16.vlgmr.msra.gmra.mxu2 %v4483_v44  ;;  %v5400_v15 = vpack.c.bf16 %v2034_v14, %v2030_v13  ;;  %v3763_v55 = vld [vmem:[%s5551_s3 + $0x48] sm:$0xff]  ;;  %v1671_v33 = vadd.f32 %v1670_v11, %v1652_v30 }
  0xf7   : > { %2313 = vmatpush.bf16.msrb.mxu0 %v3754_v8  ;;  %3411 = vmatmul.msk.bf16.vlgmr.msra.gmra.mxu3 %vm1483_vm0, %v4494_v49  ;;  %v3776_v8 = vld [vmem:[%s5551_s3 + $0xb0] sm:$0xff]  ;;  %v3775_v13 = vld [vmem:[%s5551_s3 + $0xa8] sm:$0xff] }
  0xf8   : > { %1973 = vmatmul.bf16.vlgmr.msra.gmra.mxu1 %v4481_v43  ;;  %v3762_v43 = vld [vmem:[%s5551_s3 + $0x40] sm:$0xff]  ;;  %2345 = vmatpush.bf16.msrb.mxu2 %v3776_v8 }
  0xf9   : > { %v1689_v19 = vpop.f32.mrf.mxu2  ;;  %2331 = vmatpush.bf16.msrb.mxu1 %v3763_v55 }
  0xfa   : > { %v1708_v20 = vpop.f32.mrf.mxu3  ;;  %v1690_v35 = vadd.f32 %v1689_v19, %v1671_v33 }
  0xfb   : > { %v1653_v21 = vpop.f32.mrf.mxu0 }
  0xfc   : > { %v1654_v34 = vadd.f32 %v1653_v21, %v1635_v32  ;;  %v1709_v18 = vadd.f32 %v1708_v20, %v1690_v35  ;;  %2346 = vmatpush.bf16.msrb.mxu2 %v3775_v13  ;;  %v3774_v21 = vld [vmem:[%s5551_s3 + $0xa0] sm:$0xff] }
  0xfd   : > { %v1672_v23 = vpop.f32.mrf.mxu1  ;;  %2332 = vmatpush.bf16.msrb.mxu1 %v3762_v43  ;;  %v3770_v32 = vld [vmem:[%s5551_s3 + $0x80] sm:$0xff] }
 0x100   : > { %2347 = vmatpush.bf16.msrb.mxu2 %v3774_v21 }
 0x101   : > { %v1691_v44 = vpop.f32.mrf.mxu2 }
 0x102   : > { %v1710_v49 = vpop.f32.mrf.mxu3 }
 0x103   : > { %v1656_v45 = vpop.f32.mrf.mxu0 }
 0x104   : > { %v1657_v22 = vadd.f32 %v1656_v45, %v1638_v25  ;;  %v3773_v45 = vld [vmem:[%s5551_s3 + $0x98] sm:$0xff] }
 0x105   : > { %v1675_v24 = vpop.f32.mrf.mxu1  ;;  %2348 = vmatpush.bf16.msrb.mxu2 %v3773_v45 }
 0x106   : > { %1959 = vmatmul.bf16.gmra.mxu0 %v4370_v41  ;;  %1997 = vmatmul.bf16.gmra.mxu2 %v4596_v48  ;;  %v1673_v48 = vadd.f32 %v1672_v23, %v1654_v34  ;;  %v1676_v62 = vadd.f32 %v1675_v24, %v1657_v22  ;;  %v3784_v22 = vld [vmem:[%s5551_s3 + $0xf0] sm:$0xff] }
 0x107   : > { %3412 = vmatmul.msk.bf16.gmra.mxu3 %vm1483_vm0, %v4607_v56 }
 0x108   : > { %1978 = vmatmul.bf16.gmra.mxu1 %v4594_v47  ;;  %v1692_v2 = vadd.f32 %v1691_v44, %v1673_v48 }
 0x109   : > { %v1694_v50 = vpop.f32.mrf.mxu2  ;;  %2349 = vmatpush.bf16.msrb.mxu2 %v3772_v27 }
 0x10a   : > { %v1713_v51 = vpop.f32.mrf.mxu3  ;;  %v1711_v46 = vadd.f32 %v1710_v49, %v1692_v2  ;;  %v1695_v36 = vadd.f32 %v1694_v50, %v1676_v62  ;;  %v3785_v2 = vld [vmem:[%s5551_s3 + $0xf8] sm:$0xff] }
 0x10b   : > { %v1658_v28 = vpop.f32.mrf.mxu0  ;;  %2363 = vmatpush.bf16.msrb.mxu3 %v3785_v2 }
 0x10c   : > { %v1659_v63 = vadd.f32 %v1658_v28, %v1640_v60  ;;  %v1714_v6 = vadd.f32 %v1713_v51, %v1695_v36  ;;  %v3771_v28 = vld [vmem:[%s5551_s3 + $0x88] sm:$0xff]  ;;  %v3782_v36 = vld [vmem:[%s5551_s3 + $0xe0] sm:$0xff] }
 0x10d   : > { %v1677_v29 = vpop.f32.mrf.mxu1  ;;  %2350 = vmatpush.bf16.msrb.mxu2 %v3771_v28 }
 0x10e   : > { %v1678_v5 = vadd.f32 %v1677_v29, %v1659_v63 }
 0x10f   : > { %2364 = vmatpush.bf16.msrb.mxu3 %v3784_v22 }
 0x111   : > { %v1696_v41 = vpop.f32.mrf.mxu2  ;;  %2351 = vmatpush.bf16.msrb.mxu2 %v3770_v32 }
 0x112   : > { %v1715_v38 = vpop.f32.mrf.mxu3  ;;  %v1697_v7 = vadd.f32 %v1696_v41, %v1678_v5 }
 0x113   : > { %v1727_v47 = vpop.f32.mrf.mxu0 }
 0x114   : > { %v1728_v56 = vadd.f32 %v1727_v47, %v1709_v18  ;;  %v1716_v10 = vadd.f32 %v1715_v38, %v1697_v7  ;;  %v497_v38 = vperm.slane %v5079_v16, 2 }
 0x115   : > { %v1746_v39 = vpop.f32.mrf.mxu1 }
 0x116   : > { %2314 = vmatmul.bf16.vlgmr.msrb.gmra.mxu0 %v5364_v58  ;;  %v1747_v57 = vadd.f32 %v1746_v39, %v1728_v56 }
 0x118   : > { %v2023_v0 = vmax.f32 %v1747_v57, 0.0 }
 0x119   : > { %v5421_v52 = vpop.f32.mrf.mxu2 }
 0x11a   : > { %v5423_v53 = vpop.f32.mrf.mxu3  ;;  %v1766_v47 = vadd.f32 %v5421_v52, %v497_v38 }
 0x11b   : > { %v1729_v42 = vpop.f32.mrf.mxu0 }
 0x11c   : > { %v1730_v59 = vadd.f32 %v1729_v42, %v1711_v46  ;;  %v1785_v46 = vadd.f32 %v5423_v53, %v1766_v47 }
 0x11d   : > { %v1748_v54 = vpop.f32.mrf.mxu1 }
 0x11e   : > { %v1749_v31 = vadd.f32 %v1748_v54, %v1730_v59 }
 0x120   : > { %v2027_v58 = vmax.f32 %v1749_v31, 0.0  ;;  %v3783_v31 = vld [vmem:[%s5551_s3 + $0xe8] sm:$0xff] }
 0x121   : > { %v1767_v61 = vpop.f32.mrf.mxu2  ;;  %2365 = vmatpush.bf16.msrb.mxu3 %v3783_v31 }
 0x122   : > { %v2039_v37 = vpack.c.bf16 %v2027_v58, %v2023_v0  ;;  %v1786_v1 = vpop.f32.mrf.mxu3  ;;  %v1768_v39 = vadd.f32 %v1767_v61, %v497_v38 }
 0x123   : > { %v1732_v40 = vpop.f32.mrf.mxu0 }
 0x124   : > { %2333 = vmatmul.bf16.vlgmr.msrb.gmra.mxu1 %v2039_v37  ;;  %v1733_v9 = vadd.f32 %v1732_v40, %v1714_v6  ;;  %v1787_v42 = vadd.f32 %v1786_v1, %v1768_v39  ;;  %v3781_v6 = vld [vmem:[%s5551_s3 + $0xd8] sm:$0xff] }
 0x125   : > { %v1751_v4 = vpop.f32.mrf.mxu1  ;;  %2366 = vmatpush.bf16.msrb.mxu3 %v3782_v36 }
 0x126   : > { %2319 = vmatmul.bf16.gmra.mxu0 %v5400_v15  ;;  %v1752_v19 = vadd.f32 %v1751_v4, %v1733_v9 }
 0x128   : > { %v2031_v23 = vmax.f32 %v1752_v19, 0.0  ;;  %v3780_v19 = vld [vmem:[%s5551_s3 + $0xd0] sm:$0xff] }
 0x129   : > { %v1770_v11 = vpop.f32.mrf.mxu2  ;;  %2367 = vmatpush.bf16.msrb.mxu3 %v3781_v6 }
 0x12a   : > { %v5433_v12 = vpop.f32.mrf.mxu3  ;;  %v1771_v37 = vadd.f32 %v1770_v11, %v497_v38 }
 0x12b   : > { %v1734_v14 = vpop.f32.mrf.mxu0 }
 0x12c   : > { %v1735_v20 = vadd.f32 %v1734_v14, %v1716_v10  ;;  %v1790_v9 = vadd.f32 %v5433_v12, %v1771_v37  ;;  %v3779_v12 = vld [vmem:[%s5551_s3 + $0xc8] sm:$0xff] }
 0x12d   : > { %v1753_v17 = vpop.f32.mrf.mxu1  ;;  %2368 = vmatpush.bf16.msrb.mxu3 %v3780_v19 }
 0x12e   : > { %v1754_v15 = vadd.f32 %v1753_v17, %v1735_v20 }
 0x130   : > { %v2035_v55 = vmax.f32 %v1754_v15, 0.0 }
 0x131   : > { %v1772_v44 = vpop.f32.mrf.mxu2  ;;  %2369 = vmatpush.bf16.msrb.mxu3 %v3779_v12 }
 0x132   : > { %v2043_v43 = vpack.c.bf16 %v2035_v55, %v2031_v23  ;;  %v1791_v49 = vpop.f32.mrf.mxu3  ;;  %v1773_v1 = vadd.f32 %v1772_v44, %v497_v38 }
 0x133   : > { %v1803_v24 = vpop.f32.mrf.mxu0 }
 0x134   : > { %2338 = vmatmul.bf16.gmra.mxu1 %v2043_v43  ;;  %v1804_v54 = vadd.f32 %v1803_v24, %v1785_v46  ;;  %v1792_v13 = vadd.f32 %v1791_v49, %v1773_v1 }
 0x135   : > { %v1822_v26 = vpop.f32.mrf.mxu1 }
 0x136   : > { %v1823_v52 = vadd.f32 %v1822_v26, %v1804_v54  ;;  %v3778_v26 = vld [vmem:[%s5551_s3 + $0xc0] sm:$0xff] }
 0x137   : > { %2370 = vmatpush.bf16.msrb.mxu3 %v3778_v26 }
 0x139   : > { %v1841_v50 = vpop.f32.mrf.mxu2 }
 0x13a   : > { %v1860_v51 = vpop.f32.mrf.mxu3  ;;  %v1842_v0 = vadd.f32 %v1841_v50, %v1823_v52 }
 0x13b   : > { %v1805_v29 = vpop.f32.mrf.mxu0 }
 0x13c   : > { %v1806_v57 = vadd.f32 %v1805_v29, %v1787_v42  ;;  %v1861_v61 = vadd.f32 %v1860_v51, %v1842_v0 }
 0x13d   : > { %v1824_v30 = vpop.f32.mrf.mxu1 }
 0x13e   : > { %v1825_v53 = vadd.f32 %v1824_v30, %v1806_v57  ;;  %v498_v30 = vperm.slane %v5079_v16, 3 }
 0x141   : > { %v1843_v33 = vpop.f32.mrf.mxu2 }
 0x142   : > { %v1862_v34 = vpop.f32.mrf.mxu3  ;;  %v1844_v58 = vadd.f32 %v1843_v33, %v1825_v53 }
 0x143   : > { %v1808_v35 = vpop.f32.mrf.mxu0 }
 0x144   : > { %v1863_v3 = vadd.f32 %v1862_v34, %v1844_v58  ;;  %v1809_v14 = vadd.f32 %v1808_v35, %v1790_v9 }
 0x145   : > { %v1827_v41 = vpop.f32.mrf.mxu1 }
 0x146   : > { %v1828_v21 = vadd.f32 %v1827_v41, %v1809_v14 }
 0x149   : > { %v1846_v48 = vpop.f32.mrf.mxu2 }
 0x14a   : > { %v1865_v18 = vpop.f32.mrf.mxu3  ;;  %v1847_v49 = vadd.f32 %v1846_v48, %v1828_v21 }
 0x14b   : > { %v1810_v56 = vpop.f32.mrf.mxu0 }
 0x14c   : > { %v1811_v20 = vadd.f32 %v1810_v56, %v1792_v13  ;;  %v1866_v27 = vadd.f32 %v1865_v18, %v1847_v49 }
 0x14d   : > { %v1829_v25 = vpop.f32.mrf.mxu1 }
 0x14e   : > { %v1830_v45 = vadd.f32 %v1829_v25, %v1811_v20 }
 0x151   : > { %v1848_v59 = vpop.f32.mrf.mxu2 }
 0x152   : > { %v1867_v60 = vpop.f32.mrf.mxu3  ;;  %v1849_v24 = vadd.f32 %v1848_v59, %v1830_v45 }
 0x153   : > { %v1879_v62 = vpop.f32.mrf.mxu0 }
 0x154   : > { %v1880_v40 = vadd.f32 %v1879_v62, %v1861_v61  ;;  %v1868_v50 = vadd.f32 %v1867_v60, %v1849_v24 }
 0x155   : > { %v1898_v63 = vpop.f32.mrf.mxu1 }
 0x156   : > { %v2024_v11 = vmax.f32 %v1880_v40, 0.0  ;;  %v1899_v38 = vadd.f32 %v1898_v63, %v498_v30 }
 0x159   : > { %v1917_v4 = vpop.f32.mrf.mxu2 }
 0x15a   : > { %v1936_v5 = vpop.f32.mrf.mxu3  ;;  %v1918_v2 = vadd.f32 %v1917_v4, %v1899_v38 }
 0x15b   : > { %v1881_v7 = vpop.f32.mrf.mxu0 }
 0x15c   : > { %v1882_v10 = vadd.f32 %v1881_v7, %v1863_v3  ;;  %v1937_v46 = vadd.f32 %v1936_v5, %v1918_v2 }
 0x15d   : > { %v1900_v8 = vpop.f32.mrf.mxu1 }
 0x15e   : > { %v2028_v17 = vmax.f32 %v1882_v10, 0.0  ;;  %v1901_v25 = vadd.f32 %v1900_v8, %v498_v30 }
 0x160   : > { %v2040_v15 = vpack.c.bf16 %v2028_v17, %v2024_v11 }
 0x161   : > { %v1919_v23 = vpop.f32.mrf.mxu2 }
 0x162   : > { %v1938_v55 = vpop.f32.mrf.mxu3  ;;  %2352 = vmatmul.bf16.vlgmr.msrb.gmra.mxu2 %v2040_v15  ;;  %v1920_v42 = vadd.f32 %v1919_v23, %v1901_v25 }
 0x163   : > { %v1884_v43 = vpop.f32.mrf.mxu0 }
 0x164   : > { %v1885_v51 = vadd.f32 %v1884_v43, %v1866_v27  ;;  %v1939_v16 = vadd.f32 %v1938_v55, %v1920_v42 }
 0x165   : > { %v1903_v44 = vpop.f32.mrf.mxu1 }
 0x166   : > { %v2032_v35 = vmax.f32 %v1885_v51, 0.0  ;;  %v1904_v62 = vadd.f32 %v1903_v44, %v498_v30 }
 0x169   : > { %v1922_v28 = vpop.f32.mrf.mxu2 }
 0x16a   : > { %v1941_v29 = vpop.f32.mrf.mxu3  ;;  %v1923_v36 = vadd.f32 %v1922_v28, %v1904_v62  ;;  %v3878_v28 = vld [vmem:[%s5552_s4] ss:$0 sm:$0xff] }
 0x16b   : > { %v1886_v32 = vpop.f32.mrf.mxu0 }
 0x16c   : > { %v1887_v34 = vadd.f32 %v1886_v32, %v1868_v50  ;;  %v1942_v5 = vadd.f32 %v1941_v29, %v1923_v36 }
 0x16d   : > { %v1905_v33 = vpop.f32.mrf.mxu1 }
 0x16e   : > { %v2036_v41 = vmax.f32 %v1887_v34, 0.0  ;;  %v1906_v3 = vadd.f32 %v1905_v33, %v498_v30 }
 0x170   : > { %v2044_v47 = vpack.c.bf16 %v2036_v41, %v2032_v35 }
 0x171   : > { %v1924_v39 = vpop.f32.mrf.mxu2 }
 0x172   : > { %v1943_v48 = vpop.f32.mrf.mxu3  ;;  %2357 = vmatmul.bf16.gmra.mxu2 %v2044_v47  ;;  %v1925_v6 = vadd.f32 %v1924_v39, %v1906_v3 }
 0x173   : > { %v1955_v56 = vpop.f32.mrf.mxu0 }
 0x174   : > { %v1956_v54 = vadd.f32 %v1955_v56, %v1937_v46  ;;  %v1944_v11 = vadd.f32 %v1943_v48, %v1925_v6 }
 0x175   : > { %v1974_v18 = vpop.f32.mrf.mxu1 }
 0x176   : > { %v1975_v60 = vadd.f32 %v1974_v18, %v1956_v54 }
 0x179   : > { %v1993_v22 = vpop.f32.mrf.mxu2 }
 0x17a   : > { %v2012_v57 = vpop.f32.mrf.mxu3  ;;  %v1994_v63 = vadd.f32 %v1993_v22, %v1975_v60 }
 0x17b   : > { %v1957_v52 = vpop.f32.mrf.mxu0 }
 0x17c   : > { %v1958_v31 = vadd.f32 %v1957_v52, %v1939_v16  ;;  %v2013_v37 = vadd.f32 %v2012_v57, %v1994_v63 }
 0x17d   : > { %v1976_v59 = vpop.f32.mrf.mxu1 }
 0x17e   : > { %v1977_v0 = vadd.f32 %v1976_v59, %v1958_v31  ;;  %v2025_v7 = vmax.f32 %v2013_v37, 0.0 }
 0x181   : > { %v1995_v53 = vpop.f32.mrf.mxu2 }
 0x182   : > { %v2014_v58 = vpop.f32.mrf.mxu3  ;;  %v1996_v61 = vadd.f32 %v1995_v53, %v1977_v0 }
 0x183   : > { %v1960_v1 = vpop.f32.mrf.mxu0 }
 0x184   : > { %v2015_v40 = vadd.f32 %v2014_v58, %v1996_v61  ;;  %v1961_v10 = vadd.f32 %v1960_v1, %v1942_v5 }
 0x185   : > { %v1979_v4 = vpop.f32.mrf.mxu1 }
 0x186   : > { %v2029_v8 = vmax.f32 %v2015_v40, 0.0  ;;  %v1980_v19 = vadd.f32 %v1979_v4, %v1961_v10 }
 0x188   : > { %v2041_v9 = vpack.c.bf16 %v2029_v8, %v2025_v7 }
 0x189   : > { %v1998_v13 = vpop.f32.mrf.mxu2 }
 0x18a   : > { %v2017_v14 = vpop.f32.mrf.mxu3  ;;  %2371 = vmatmul.bf16.vlgmr.msrb.gmra.mxu3 %v2041_v9  ;;  %v1999_v15 = vadd.f32 %v1998_v13, %v1980_v19 }
 0x18b   : > { %v1962_v17 = vpop.f32.mrf.mxu0 }
 0x18c   : > { %v1963_v20 = vadd.f32 %v1962_v17, %v1944_v11  ;;  %v2018_v12 = vadd.f32 %v2017_v14, %v1999_v15 }
 0x18d   : > { %v1981_v21 = vpop.f32.mrf.mxu1 }
 0x18e   : > { %v1982_v23 = vadd.f32 %v1981_v21, %v1963_v20  ;;  %v2033_v45 = vmax.f32 %v2018_v12, 0.0 }
 0x191   : > { %v2000_v55 = vpop.f32.mrf.mxu2 }
 0x192   : > { %v2001_v43 = vadd.f32 %v2000_v55, %v1982_v23  ;;  %v2019_v44 = vpop.f32.mrf.mxu3 }
 0x193   : > { %v2315_v27 = vpop.f32.mrf.mxu0 }
 0x194   : > { %v2020_v49 = vadd.f32 %v2019_v44, %v2001_v43  ;;  %v2316_v29 = vadd.f32 %v3878_v28, %v2315_v27 }
 0x196   : > { %v2037_v24 = vmax.f32 %v2020_v49, 0.0 }
 0x198   : > { %v2045_v26 = vpack.c.bf16 %v2037_v24, %v2033_v45 }
 0x19a   : > { %2376 = vmatmul.bf16.gmra.mxu3 %v2045_v26 }
 0x19b   : > { %v2317_v30 = vpop.f32.mrf.mxu0 }
 0x19c   : > { %v2318_v47 = vadd.f32 %v3878_v28, %v2317_v30 }
 0x1a1   : > { %v2334_v50 = vpop.f32.mrf.mxu1 }
 0x1a2   : > { %v2335_v32 = vadd.f32 %v2334_v50, %v2316_v29 }
 0x1a3   : > { %v2320_v48 = vpop.f32.mrf.mxu0 }
 0x1a4   : > { %v2321_v42 = vadd.f32 %v3878_v28, %v2320_v48 }
 0x1a9   : > { %v2336_v33 = vpop.f32.mrf.mxu1 }
 0x1aa   : > { %v2337_v39 = vadd.f32 %v2336_v33, %v2318_v47 }
 0x1ab   : > { %v2322_v57 = vpop.f32.mrf.mxu0 }
 0x1ac   : > { %v2323_v60 = vadd.f32 %v3878_v28, %v2322_v57 }
 0x1b1   : > { %v2339_v56 = vpop.f32.mrf.mxu1 }
 0x1b2   : > { %v2340_v54 = vadd.f32 %v2339_v56, %v2321_v42 }
 0x1b9   : > { %v2341_v59 = vpop.f32.mrf.mxu1 }
 0x1ba   : > { %v2342_v62 = vadd.f32 %v2341_v59, %v2323_v60 }
 0x1e5   : > { %v2353_v51 = vpop.f32.mrf.mxu2 }
 0x1e6   : > { %v2354_v34 = vadd.f32 %v2353_v51, %v2335_v32 }
 0x1ed   : > { %v2355_v35 = vpop.f32.mrf.mxu2 }
 0x1ee   : > { %v2356_v2 = vadd.f32 %v2355_v35, %v2337_v39 }
 0x1f5   : > { %v2358_v46 = vpop.f32.mrf.mxu2 }
 0x1f6   : > { %v2359_v22 = vadd.f32 %v2358_v46, %v2340_v54 }
 0x1fd   : > { %v2360_v31 = vpop.f32.mrf.mxu2 }
 0x1fe   : > { %v2361_v63 = vadd.f32 %v2360_v31, %v2342_v62 }
 0x20d   : > { %v2372_v41 = vpop.f32.mrf.mxu3 }
 0x20e   : > { %v2373_v38 = vadd.f32 %v2372_v41, %v2354_v34 }
 0x210   : > { %2382 = vst [vmem:[%s5486_s23] sm:$0xff] %v2373_v38 }
 0x215   : > { %v2374_v18 = vpop.f32.mrf.mxu3 }
 0x216   : > { %v2375_v25 = vadd.f32 %v2374_v18, %v2356_v2 }
 0x218   : > { %2383 = vst [vmem:[%s5486_s23 + $0x8] sm:$0xff] %v2375_v25 }
 0x21d   : > { %v2377_v16 = vpop.f32.mrf.mxu3 }
 0x21e   : > { %v2378_v52 = vadd.f32 %v2377_v16, %v2359_v22 }
 0x220   : > { %2384 = vst [vmem:[%s5486_s23 + $0x10] sm:$0xff] %v2378_v52 }
 0x224   : > { %2392 = sbr.rel (!%p4022_p4) target bundleno = 592 (0x250), region = 44 }
 0x225   : > { %v2379_v0 = vpop.f32.mrf.mxu3 }
 0x226   : > { %v2380_v53 = vadd.f32 %v2379_v0, %v2361_v63 }
 0x228   : > { %2385 = vst [vmem:[%s5486_s23 + $0x18] sm:$0xff] %v2380_v53 }
 0x229   : > { %s5562_s18 = smov (!%p2395_p8, %s2394_s18), 4 }
 0x22a   : > { %s3543_s7 = sshll.u32 %s5562_s18, 3 }
 0x22b   : > { %p3546_p9 = scmp.eq.s32.totalorder %s3543_s7, 0 }
 0x22c   : > { %s5505_s8 = sshrl.u32 (!%p3546_p9), %s5562_s18, 2 }
 0x22d   : > { %2403 = sbr.rel (%p3546_p9) target bundleno = 592 (0x250), region = 48  ;;  %p3547_p10 = scmp.le.s32.totalorder (!%p3546_p9), %s5505_s8, 0 }
 0x232   : > { %2570 = sbr.rel (%p3547_p10) target bundleno = 575 (0x23f), region = 124  ;;  %s5555_s21 = smov (!%p3547_p10), %s5499_s6 }
 0x233   : > { %s5556_s26 = smov (!%p3547_p10), %s5486_s23  ;;  %s5514_s15 = smov (!%p3547_p10), 0  }
 0x234   : > { %s3947_s9 = smov (!%p3547_p10), 0  }
 0x237 LB: >> { %v2472_v58 = vld [vmem:[%s3941_s26] sm:$0xff]  ;;  %v2474_v36 = vld [vmem:[%s3941_s26 + $0x8] sm:$0xff]  ;;  %v2476_v37 = vld [vmem:[%s3941_s26 + $0x10] sm:$0xff]  ;;  %s2480_s10 = sadd.s32 1, %s3945_s15  ;;  %s2466_s9 = sadd.s32 1, %s3949_s9   ;;  %s3949_s9 = sphi %s3947_s9, %s2466_s9   ;;  %s3945_s15 = sphi %s5514_s15, %s5557_s15   ;;  %s3941_s26 = sphi %s5556_s26, %s2485_s26   ;;  %s3937_s21 = sphi %s5555_s21, %s2486_s21  }
 0x238   : >> { %2473 = vst [vmem:[%s3937_s21] sm:$0xff] %v2472_v58  ;;  %v2478_v61 = vld [vmem:[%s3941_s26 + $0x18] sm:$0xff]  ;;  %p2481_p11 = scmp.ge.s32.totalorder %s2480_s10, %s5505_s8  ;;  %p2465_p12 = scmp.ge.s32.totalorder %s2466_s9, %s5505_s8 }
 0x239   : >> { %2475 = vst [vmem:[%s3937_s21 + $0x8] sm:$0xff] %v2474_v36 }
 0x23a   : >> { %2477 = vst [vmem:[%s3937_s21 + $0x10] sm:$0xff] %v2476_v37  ;;  %s5564_s10 = smov (%p2481_p11, %s2480_s10), 0  ;;  %2468 = sbr.rel (!%p2465_p12) target bundleno = 567 (0x237), region = 130 }
 0x23b   : >> { %2479 = vst [vmem:[%s3937_s21 + $0x18] sm:$0xff] %v2478_v61  ;;  %s3548_s11 = sshll.u32 %s5564_s10, 5  ;;  %s5557_s15 = smov %s5564_s10 }
 0x23c   : >> { %s2485_s26 = scalar_lea.vmem %s5486_s23, %s3548_s11 [#allocation2]   ;;  %s2486_s21 = scalar_lea.vmem %s5499_s6, %s3548_s11  }
 0x23f PF: > { %s5530_s12 = sand.u32 3, %s5562_s18   ;;  %s3787_s14 = sshll.u32 %s5505_s8, 5 }
 0x240   : > { %s2491_s16 = scalar_lea.vmem %s5486_s23, %s3787_s14 [#allocation2]   ;;  %s2493_s13 = scalar_lea.vmem %s5499_s6, %s3787_s14  }
 0x241   : > { %p3553_p13 = scmp.le.s32.totalorder %s5530_s12, 0 }
 0x242   : > { %s3951_s17 = smov (!%p3553_p13), %s2493_s13   ;;  %s3955_s20 = smov (!%p3553_p13), %s2491_s16  }
 0x243   : > { %2584 = sbr.rel (%p3553_p13) target bundleno = 592 (0x250), region = 135  ;;  %s3959_s24 = smov (!%p3553_p13), 0  }
 0x244   : > { %s3963_s27 = smov (!%p3553_p13), 0  }
 0x248 LB: >> { %v2503_v1 = vld [vmem:[%s3957_s20] sm:$0xff]  ;;  %s2505_s18 = sadd.s32 1, %s3961_s24  ;;  %s2497_s27 = sadd.s32 1, %s3965_s27   ;;  %s3965_s27 = sphi %s3963_s27, %s2497_s27   ;;  %s3961_s24 = sphi %s3959_s24, %s3960_s24   ;;  %s3957_s20 = sphi %s3955_s20, %s2510_s20   ;;  %s3953_s17 = sphi %s3951_s17, %s2511_s17  }
 0x249   : >> { %2504 = vst [vmem:[%s3953_s17] sm:$0xff] %v2503_v1  ;;  %p2506_p0 = scmp.ge.s32.totalorder %s2505_s18, %s5530_s12  ;;  %p2496_p1 = scmp.ge.s32.totalorder %s2497_s27, %s5530_s12 }
 0x24b   : >> { %s5566_s18 = smov (%p2506_p0, %s2505_s18), 0  ;;  %2499 = sbr.rel (!%p2496_p1) target bundleno = 584 (0x248), region = 141 }
 0x24c   : >> { %s3554_s23 = sshll.u32 %s5566_s18, 3  ;;  %s3960_s24 = smov %s5566_s18  }
 0x24d   : >> { %s2510_s20 = scalar_lea.vmem %s2491_s16, %s3554_s23 [#allocation2]   ;;  %s2511_s17 = scalar_lea.vmem %s2493_s13, %s3554_s23  }
 0x250 PF: > { %p12_p2 = scmp.ge.s32.totalorder %s4012_s22, 4   ;;  %s5558_s18 = smov %s3929_s19 }
 0x251   : > { %s5559_s19 = smov %s4020_s25  ;;  %s5560_s20 = smov %s4012_s22 }
 0x252   :  { %14 = sbr.rel (!%p12_p2) target bundleno = 2 (0x2), region = 152 }

</bundles_post_ra>
